<compile_context>
chip_gen: v7x
topology: tpu7x:2x2x1
jax: 0.10.0
libtpu: 0.0.40
codegen_flags: <defaults>
</compile_context>

<pallas_src>
import functools

import jax
import jax.numpy as jnp
from jax.experimental import pallas as pl
from jax.experimental.pallas import tpu as pltpu

LANES = 128


def _round_up(x, m):
    return (x + m - 1) // m * m


def _block_kernel(num_actions, tb,
                  # per-block inputs (leading dim = tb timesteps) + resident state/weights
                  z_ref, gsum_ref, mask_ref, h0_ref, c0_ref,
                  w_zh_ref, b_ref, phi_rep_ref, sel_ref,
                  c_w1_ref, c_b1_ref, c_w2_ref, c_b2_ref,
                  # outputs (per-block)
                  pv_ref, u_ref, co_ref,
                  # VMEM scratch carrying the recurrent state across grid steps
                  h_scr, c_scr):
    B, H = h_scr.shape

    # Load the initial recurrent state into resident VMEM scratch at step 0.
    @pl.when(pl.program_id(0) == 0)
    def _():
        h_scr[...] = h0_ref[...]
        c_scr[...] = c0_ref[...]

    # Hoist resident-weight loads and the lane iota out of the unrolled time loop.
    w_zh = w_zh_ref[...]
    bias = b_ref[...]
    phi_rep = phi_rep_ref[...]
    sel = sel_ref[...]
    c_w1 = c_w1_ref[...]
    c_b1 = c_b1_ref[...]
    c_w2 = c_w2_ref[...]
    c_b2 = c_b2_ref[...]
    lane = jax.lax.broadcasted_iota(jnp.int32, (B, LANES), 1)
    val_lane = (lane == num_actions).astype(jnp.float32)

    for tt in range(tb):                                   # static unroll over time block
        mask = mask_ref[tt]                                # (B, 1)
        hx = mask * h_scr[...]                             # (B, H)
        cx = mask * c_scr[...]                             # (B, H)

        # --- LSTMCell, fused gate matmul (single K = D2p + H weight push) ---
        zc = jnp.concatenate([z_ref[tt], hx], axis=-1)     # (B, D2p + H)
        gates = (jnp.dot(zc, w_zh, preferred_element_type=jnp.float32)
                 + bias)                                   # (B, 4H)

        # Contiguous nonlinearity slabs: sigmoid over [i|f], tanh(g), sigmoid(o).
        if_sig = jax.nn.sigmoid(gates[:, 0:2 * H])
        g_g = jnp.tanh(gates[:, 2 * H:3 * H])
        o_g = jax.nn.sigmoid(gates[:, 3 * H:4 * H])
        i_g = if_sig[:, 0:H]
        f_g = if_sig[:, H:2 * H]

        c_new = f_g * cx + i_g * g_g                       # (B, H)
        u = o_g * jnp.tanh(c_new)                          # (B, H)

        h_scr[...] = u                                     # carry to next step
        c_scr[...] = c_new
        u_ref[tt] = u
        co_ref[tt] = c_new

        # --- policy head -----------------------------------------------------
        # einsum('bk,bka->ba', phi(sum goals), u.reshape(B,K,A)) == (phi_rep(gsum)*u) @ S
        w_rep = jnp.dot(gsum_ref[tt], phi_rep,
                        preferred_element_type=jnp.float32)    # (B, H)
        logits = jnp.dot(w_rep * u, sel,
                         preferred_element_type=jnp.float32)   # (B, 128), lanes >= A are 0
        lm = jnp.where(lane < num_actions, logits, jnp.float32(-1e30))
        m = jnp.max(lm, axis=-1, keepdims=True)
        e = jnp.exp(lm - m)                                    # padded lanes -> exactly 0
        policy = e / jnp.sum(e, axis=-1, keepdims=True)        # (B, 128)

        # --- critic: Linear(H,50)->ReLU->Linear(50,1), hidden padded to 128 --
        h1 = jnp.maximum(
            jnp.dot(u, c_w1, preferred_element_type=jnp.float32) + c_b1,
            0.0,
        )                                                      # (B, 128)
        # (B,50)@(50,1) replaced by VPU multiply + lane reduce (no MXU round trip).
        val = jnp.sum(h1 * c_w2, axis=-1, keepdims=True) + c_b2  # (B, 1)

        # Packed lane-dense output slab: policy in lanes [0, A), value in lane A.
        pv_ref[tt] = policy + val * val_lane


def _prepare_weights(params, d2):
    f32 = jnp.float32
    K = params["hidden_dim_1"]
    A = params["num_actions"]
    H = K * A
    assert A + 1 <= LANES, "packed policy/value slab assumes num_actions < 128"

    d2p = _round_up(max(d2, 1), LANES)

    # Fused/stacked LSTM weight: [W_ih^T (zero-padded to d2p rows); W_hh^T].
    w_ih_t = params["w_ih"].astype(f32).T                       # (d2, 4H)
    w_hh_t = params["w_hh"].astype(f32).T                       # (H, 4H)
    w_ih_t_pad = jnp.zeros((d2p, 4 * H), f32).at[:d2, :].set(w_ih_t)
    w_zh = jnp.concatenate([w_ih_t_pad, w_hh_t], axis=0)        # (d2p + H, 4H)
    b = (params["b_ih"] + params["b_hh"]).astype(f32).reshape(1, 4 * H)

    # 0/1 matrices implementing the repeat / action-selection of the einsum.
    R = (jnp.arange(H)[None, :] // A == jnp.arange(K)[:, None]).astype(f32)  # (K, H)
    S = (jnp.arange(H)[:, None] % A == jnp.arange(A)[None, :]).astype(f32)   # (H, A)
    phi_rep = params["phi_w"].astype(f32).T @ R                              # (d2, H)
    sel_pad = jnp.zeros((H, LANES), f32).at[:, :A].set(S)                    # (H, 128)

    # Critic weights, hidden width zero-padded to a multiple of 128 lanes.
    c_hidden = params["c_w1"].shape[0]
    chp = _round_up(c_hidden, LANES)
    c_w1_pad = jnp.zeros((H, chp), f32).at[:, :c_hidden].set(
        params["c_w1"].astype(f32).T)
    c_b1_pad = jnp.zeros((1, chp), f32).at[:, :c_hidden].set(
        params["c_b1"].astype(f32).reshape(1, -1))
    c_w2_pad = jnp.zeros((1, chp), f32).at[:, :c_hidden].set(
        params["c_w2"].astype(f32).reshape(1, -1))
    c_b2 = params["c_b2"].astype(f32).reshape(1, 1)

    return dict(H=H, A=A, d2p=d2p, chp=chp,
                w_zh=w_zh, b=b, phi_rep=phi_rep, sel=sel_pad,
                c_w1=c_w1_pad, c_b1=c_b1_pad, c_w2=c_w2_pad, c_b2=c_b2)


def hierarchy1_rollout(params, z_seq, gsum_seq, mask_seq, h0, c0, *, time_block=4):
    """Run T Hierarchy1 forward steps in one pallas_call (weights stay resident).

    z_seq:    (T, B, D2)  per-step LSTM inputs
    gsum_seq: (T, B, D2)  per-step sum of the goals list
    mask_seq: (T, B, 1)   per-step mask applied to the incoming hidden state
    h0, c0:   (B, H)      initial recurrent state
    returns (policy (T,B,A), u_seq (T,B,H), c_seq (T,B,H), value (T,B,1))
    """
    T, B, D2 = z_seq.shape
    w = _prepare_weights(params, D2)
    H, A, d2p, chp = w["H"], w["A"], w["d2p"], w["chp"]
    f32 = jnp.float32

    # tb timesteps are processed per grid iteration (statically unrolled in-kernel)
    # to amortize the per-grid-step pipeline overhead.  Pad T up to a multiple.
    tb = max(1, min(time_block, T))
    Tp = _round_up(T, tb)
    n_blocks = Tp // tb

    # Pad z to 128 lanes so the in-kernel [z | hx] concat is lane-aligned; pad time.
    z_pad = jnp.zeros((Tp, B, d2p), f32).at[:T, :, :D2].set(z_seq.astype(f32))
    gsum_pad = jnp.zeros((Tp, B, D2), f32).at[:T].set(gsum_seq.astype(f32))
    mask_pad = jnp.zeros((Tp, B, 1), f32).at[:T].set(mask_seq.astype(f32))

    def resident(shape):           # weight / initial-state blocks: DMA'd once
        nd = len(shape)
        return pl.BlockSpec(shape, lambda i, _n=nd: (0,) * _n)

    def per_block(shape):          # per-time-block inputs/outputs
        return pl.BlockSpec((tb,) + shape, lambda i: (i, 0, 0))

    in_specs = [
        per_block((B, d2p)),           # z (padded)
        per_block((B, D2)),            # goal sum
        per_block((B, 1)),             # mask
        resident((B, H)),              # h0
        resident((B, H)),              # c0
        resident((d2p + H, 4 * H)),    # stacked LSTM weight
        resident((1, 4 * H)),          # LSTM bias (b_ih + b_hh)
        resident((D2, H)),             # phi_rep
        resident((H, LANES)),          # action-selection matrix (padded)
        resident((H, chp)),            # critic fc1 weight (padded)
        resident((1, chp)),            # critic fc1 bias   (padded)
        resident((1, chp)),            # critic out weight row (padded)
        resident((1, 1)),              # critic out bias
    ]
    out_specs = (
        per_block((B, LANES)),         # packed policy/value slab
        per_block((B, H)),             # u  (new hidden)
        per_block((B, H)),             # cx (new cell)
    )
    out_shape = (
        jax.ShapeDtypeStruct((Tp, B, LANES), f32),
        jax.ShapeDtypeStruct((Tp, B, H), f32),
        jax.ShapeDtypeStruct((Tp, B, H), f32),
    )

    flops_step = (2 * B * (d2p + H) * 4 * H          # fused gate matmul
                  + 2 * B * D2 * H                   # phi_rep matmul
                  + 2 * B * H * LANES                # logits matmul
                  + 2 * B * H * chp                  # critic fc1
                  + 16 * B * H)                      # elementwise
    bytes_weights = 4 * ((d2p + H) * 4 * H + 4 * H + D2 * H + H * LANES
                         + H * chp + 2 * chp + 1 + 2 * B * H)
    bytes_step = 4 * (B * d2p + B * D2 + B + B * LANES + 2 * B * H)
    cost = pl.CostEstimate(
        flops=int(Tp * flops_step),
        transcendentals=int(Tp * (5 * B * H + B * LANES)),
        bytes_accessed=int(bytes_weights + Tp * bytes_step),
    )

    pv, u_seq, c_seq = pl.pallas_call(
        functools.partial(_block_kernel, A, tb),
        out_shape=out_shape,
        grid_spec=pltpu.PrefetchScalarGridSpec(
            num_scalar_prefetch=0,
            grid=(n_blocks,),
            in_specs=in_specs,
            out_specs=out_specs,
            scratch_shapes=[pltpu.VMEM((B, H), f32),   # h carried across steps
                            pltpu.VMEM((B, H), f32)],  # c carried across steps
        ),
        compiler_params=pltpu.CompilerParams(
            dimension_semantics=("arbitrary",)),       # sequential recurrence
        cost_estimate=cost,
    )(z_pad, gsum_pad, mask_pad,
      h0.astype(f32), c0.astype(f32),
      w["w_zh"], w["b"], w["phi_rep"], w["sel"],
      w["c_w1"], w["c_b1"], w["c_w2"], w["c_b2"])

    policy = pv[:T, :, :A]
    value = pv[:T, :, A:A + 1]
    return policy, u_seq[:T], c_seq[:T], value


def hierarchy1_forward(params, z, goals_stacked, hx, cx, mask):
    """Single Hierarchy1.forward step (module semantics) = rollout with T=1."""
    gsum = goals_stacked.sum(axis=0)                   # sum over the goals list
    policy, u_seq, c_seq, value = hierarchy1_rollout(
        params, z[None], gsum[None], mask[None], hx, cx)
    # .to('cpu') in the torch module is host placement glue, not kernel compute.
    return policy[0], (u_seq[0], c_seq[0]), value[0]


def hierarchy1_reference(params, z, goals_stacked, hx, cx, mask):
    """Pure-JAX reference mirroring the PyTorch forward (one step)."""
    K = params["hidden_dim_1"]
    A = params["num_actions"]
    hx_m = mask * hx
    cx_m = mask * cx
    gates = (z @ params["w_ih"].T + params["b_ih"]
             + hx_m @ params["w_hh"].T + params["b_hh"])
    i_g, f_g, g_g, o_g = jnp.split(gates, 4, axis=1)
    c_new = jax.nn.sigmoid(f_g) * cx_m + jax.nn.sigmoid(i_g) * jnp.tanh(g_g)
    u = jax.nn.sigmoid(o_g) * jnp.tanh(c_new)
    gsum = goals_stacked.sum(axis=0)
    wphi = gsum @ params["phi_w"].T
    logits = jnp.einsum("bk,bka->ba", wphi, u.reshape(u.shape[0], K, A))
    policy = jax.nn.softmax(logits, axis=-1)
    h1 = jnp.maximum(u @ params["c_w1"].T + params["c_b1"], 0.0)
    value = h1 @ params["c_w2"].T + params["c_b2"]
    return policy, (u, c_new), value


if __name__ == "__main__":
    # small shapes consistent with the module
    num_workers = 8          # batch B
    hidden_dim_2 = 32        # z / goal feature dim
    hidden_dim_1 = 32        # K
    num_actions = 4          # A
    H = hidden_dim_1 * num_actions   # 128
    G = 3                    # number of goals in the list
    T = 6                    # rollout length for the gridded multi-step path

    key = jax.random.PRNGKey(0)
    keys = jax.random.split(key, 20)

    def rnd(k, shape, scale=0.1):
        return scale * jax.random.normal(k, shape, dtype=jnp.float32)

    # single-step inputs (exact module forward)
    z = rnd(keys[0], (num_workers, hidden_dim_2), 1.0)
    goals_stacked = rnd(keys[1], (G, num_workers, hidden_dim_2), 1.0)
    hx = rnd(keys[2], (num_workers, H), 1.0)
    cx = rnd(keys[3], (num_workers, H), 1.0)
    mask = (jax.random.uniform(keys[4], (num_workers, 1)) > 0.2).astype(jnp.float32)

    # deterministic synthetic parameters (shapes from the module __init__)
    params = dict(
        hidden_dim_1=hidden_dim_1,
        num_actions=num_actions,
        w_ih=rnd(keys[5], (4 * H, hidden_dim_2)),    # LSTMCell W_ih
        w_hh=rnd(keys[6], (4 * H, H)),               # LSTMCell W_hh
        b_ih=rnd(keys[7], (4 * H,)),
        b_hh=rnd(keys[8], (4 * H,)),
        phi_w=rnd(keys[9], (hidden_dim_1, hidden_dim_2)),  # Linear(D2, K, bias=False)
        c_w1=rnd(keys[10], (50, H)),                 # critic fc1
        c_b1=rnd(keys[11], (50,)),
        c_w2=rnd(keys[12], (1, 50)),                 # critic out
        c_b2=rnd(keys[13], (1,)),
    )

    # --- single-step check (module semantics) ------------------------------
    policy, (u, cx_new), value = hierarchy1_forward(
        params, z, goals_stacked, hx, cx, mask)
    jax.block_until_ready((policy, u, cx_new, value))

    p_ref, (u_ref, c_ref), v_ref = hierarchy1_reference(
        params, z, goals_stacked, hx, cx, mask)
    assert jnp.allclose(policy, p_ref, atol=1e-5, rtol=1e-5)
    assert jnp.allclose(u, u_ref, atol=1e-5, rtol=1e-5)
    assert jnp.allclose(cx_new, c_ref, atol=1e-5, rtol=1e-5)
    assert jnp.allclose(value, v_ref, atol=1e-5, rtol=1e-5)

    # --- multi-step rollout check (time loop amortized inside one call) ----
    z_seq = rnd(keys[14], (T, num_workers, hidden_dim_2), 1.0)
    goals_seq = rnd(keys[15], (T, G, num_workers, hidden_dim_2), 1.0)
    mask_seq = (jax.random.uniform(keys[16], (T, num_workers, 1)) > 0.2
                ).astype(jnp.float32)
    gsum_seq = goals_seq.sum(axis=1)

    pol_seq, u_seq, c_seq, val_seq = hierarchy1_rollout(
        params, z_seq, gsum_seq, mask_seq, hx, cx, time_block=4)
    jax.block_until_ready((pol_seq, u_seq, c_seq, val_seq))

    h_r, c_r = hx, cx
    for t in range(T):
        p_r, (h_r, c_r), v_r = hierarchy1_reference(
            params, z_seq[t], goals_seq[t], h_r, c_r, mask_seq[t])
        assert jnp.allclose(pol_seq[t], p_r, atol=1e-5, rtol=1e-5)
        assert jnp.allclose(u_seq[t], h_r, atol=1e-5, rtol=1e-5)
        assert jnp.allclose(c_seq[t], c_r, atol=1e-5, rtol=1e-5)
        assert jnp.allclose(val_seq[t], v_r, atol=1e-5, rtol=1e-5)

    print("KERNEL_OK")
</pallas_src>

<mosaic_0001>
module attributes {stable_mosaic.version = 11 : i64} {
  func.func @_block_kernel(%arg0: i32, %arg1: memref<1x8x128xf32, #tpu.memory_space<vmem>>, %arg2: memref<1x8x32xf32, #tpu.memory_space<vmem>>, %arg3: memref<1x8x1xf32, #tpu.memory_space<vmem>>, %arg4: memref<8x128xf32, #tpu.memory_space<vmem>>, %arg5: memref<8x128xf32, #tpu.memory_space<vmem>>, %arg6: memref<256x512xf32, #tpu.memory_space<vmem>>, %arg7: memref<1x512xf32, #tpu.memory_space<vmem>>, %arg8: memref<32x128xf32, #tpu.memory_space<vmem>>, %arg9: memref<128x128xf32, #tpu.memory_space<vmem>>, %arg10: memref<128x128xf32, #tpu.memory_space<vmem>>, %arg11: memref<1x128xf32, #tpu.memory_space<vmem>>, %arg12: memref<1x128xf32, #tpu.memory_space<vmem>>, %arg13: memref<1x1xf32, #tpu.memory_space<vmem>>, %arg14: memref<1x8x128xf32, #tpu.memory_space<vmem>>, %arg15: memref<1x8x128xf32, #tpu.memory_space<vmem>>, %arg16: memref<1x8x128xf32, #tpu.memory_space<vmem>>, %arg17: memref<8x128xf32, #tpu.memory_space<vmem>>, %arg18: memref<8x128xf32, #tpu.memory_space<vmem>>) attributes {dimension_semantics = [#tpu.dimension_semantics<arbitrary>], iteration_bounds = array<i64: 1>, scalar_prefetch = 0 : i64, scratch_operands = 2 : i64, tpu.core_type = #tpu.core_type<tc>, window_params = [{transform_indices = @transform_0, window_bounds = array<i64: 1, 8, 128>}, {transform_indices = @transform_1, window_bounds = array<i64: 1, 8, 32>}, {transform_indices = @transform_2, window_bounds = array<i64: 1, 8, 1>}, {pipeline_mode = #tpu.pipeline_mode<synchronous>, transform_indices = @transform_3, window_bounds = array<i64: 8, 128>}, {pipeline_mode = #tpu.pipeline_mode<synchronous>, transform_indices = @transform_4, window_bounds = array<i64: 8, 128>}, {pipeline_mode = #tpu.pipeline_mode<synchronous>, transform_indices = @transform_5, window_bounds = array<i64: 256, 512>}, {pipeline_mode = #tpu.pipeline_mode<synchronous>, transform_indices = @transform_6, window_bounds = array<i64: 1, 512>}, {pipeline_mode = #tpu.pipeline_mode<synchronous>, transform_indices = @transform_7, window_bounds = array<i64: 32, 128>}, {pipeline_mode = #tpu.pipeline_mode<synchronous>, transform_indices = @transform_8, window_bounds = array<i64: 128, 128>}, {pipeline_mode = #tpu.pipeline_mode<synchronous>, transform_indices = @transform_9, window_bounds = array<i64: 128, 128>}, {pipeline_mode = #tpu.pipeline_mode<synchronous>, transform_indices = @transform_10, window_bounds = array<i64: 1, 128>}, {pipeline_mode = #tpu.pipeline_mode<synchronous>, transform_indices = @transform_11, window_bounds = array<i64: 1, 128>}, {pipeline_mode = #tpu.pipeline_mode<synchronous>, transform_indices = @transform_12, window_bounds = array<i64: 1, 1>}, {transform_indices = @transform_13, window_bounds = array<i64: 1, 8, 128>}, {transform_indices = @transform_14, window_bounds = array<i64: 1, 8, 128>}, {transform_indices = @transform_15, window_bounds = array<i64: 1, 8, 128>}]} {
    %c0_i32 = arith.constant 0 : i32
    %0 = arith.cmpi eq, %arg0, %c0_i32 : i32
    %1 = arith.extui %0 : i1 to i32
    %c0_i32_0 = arith.constant 0 : i32
    %2 = arith.cmpi ne, %1, %c0_i32_0 : i32
    scf.if %2 {
      %c0_53 = arith.constant 0 : index
      %c0_54 = arith.constant 0 : index
      %94 = vector.load %arg4[%c0_53, %c0_54] : memref<8x128xf32, #tpu.memory_space<vmem>>, vector<8x128xf32>
      %c0_55 = arith.constant 0 : index
      %c0_56 = arith.constant 0 : index
      %95 = vector.load %arg17[%c0_55, %c0_56] : memref<8x128xf32, #tpu.memory_space<vmem>>, vector<8x128xf32>
      tpu.vector_store %arg17[%c0_55, %c0_56], %94 {strides = array<i32>} : memref<8x128xf32, #tpu.memory_space<vmem>>, vector<8x128xf32>,
      %c0_57 = arith.constant 0 : index
      %c0_58 = arith.constant 0 : index
      %96 = vector.load %arg5[%c0_57, %c0_58] : memref<8x128xf32, #tpu.memory_space<vmem>>, vector<8x128xf32>
      %c0_59 = arith.constant 0 : index
      %c0_60 = arith.constant 0 : index
      %97 = vector.load %arg18[%c0_59, %c0_60] : memref<8x128xf32, #tpu.memory_space<vmem>>, vector<8x128xf32>
      tpu.vector_store %arg18[%c0_59, %c0_60], %96 {strides = array<i32>} : memref<8x128xf32, #tpu.memory_space<vmem>>, vector<8x128xf32>,
    } else {
    }
    %c0 = arith.constant 0 : index
    %c0_1 = arith.constant 0 : index
    %3 = vector.load %arg6[%c0, %c0_1] : memref<256x512xf32, #tpu.memory_space<vmem>>, vector<256x512xf32>
    %c0_2 = arith.constant 0 : index
    %c0_3 = arith.constant 0 : index
    %4 = vector.load %arg7[%c0_2, %c0_3] : memref<1x512xf32, #tpu.memory_space<vmem>>, vector<1x512xf32>
    %c0_4 = arith.constant 0 : index
    %c0_5 = arith.constant 0 : index
    %5 = vector.load %arg8[%c0_4, %c0_5] : memref<32x128xf32, #tpu.memory_space<vmem>>, vector<32x128xf32>
    %c0_6 = arith.constant 0 : index
    %c0_7 = arith.constant 0 : index
    %6 = vector.load %arg9[%c0_6, %c0_7] : memref<128x128xf32, #tpu.memory_space<vmem>>, vector<128x128xf32>
    %c0_8 = arith.constant 0 : index
    %c0_9 = arith.constant 0 : index
    %7 = vector.load %arg10[%c0_8, %c0_9] : memref<128x128xf32, #tpu.memory_space<vmem>>, vector<128x128xf32>
    %c0_10 = arith.constant 0 : index
    %c0_11 = arith.constant 0 : index
    %8 = vector.load %arg11[%c0_10, %c0_11] : memref<1x128xf32, #tpu.memory_space<vmem>>, vector<1x128xf32>
    %c0_12 = arith.constant 0 : index
    %c0_13 = arith.constant 0 : index
    %9 = vector.load %arg12[%c0_12, %c0_13] : memref<1x128xf32, #tpu.memory_space<vmem>>, vector<1x128xf32>
    %c0_14 = arith.constant 0 : index
    %c0_15 = arith.constant 0 : index
    %10 = vector.load %arg13[%c0_14, %c0_15] : memref<1x1xf32, #tpu.memory_space<vmem>>, vector<1x1xf32>
    %11 = tpu.iota {dimensions = array<i32: 1>} : vector<8x128xi32>
    %c4_i32 = arith.constant 4 : i32
    %12 = vector.broadcast %c4_i32 : i32 to vector<8x128xi32>
    %13 = arith.cmpi eq, %11, %12 : vector<8x128xi32>
    %14 = arith.extui %13 : vector<8x128xi1> to vector<8x128xi32>
    %15 = arith.sitofp %14 : vector<8x128xi32> to vector<8x128xf32>
    %c0_16 = arith.constant 0 : index
    %c0_17 = arith.constant 0 : index
    %c0_18 = arith.constant 0 : index
    %16 = vector.load %arg3[%c0_16, %c0_17, %c0_18] : memref<1x8x1xf32, #tpu.memory_space<vmem>>, vector<1x8x1xf32>
    %17 = vector.shape_cast %16 : vector<1x8x1xf32> to vector<8x1xf32>
    %c0_19 = arith.constant 0 : index
    %c0_20 = arith.constant 0 : index
    %18 = vector.load %arg17[%c0_19, %c0_20] : memref<8x128xf32, #tpu.memory_space<vmem>>, vector<8x128xf32>
    %19 = vector.broadcast %17 : vector<8x1xf32> to vector<8x128xf32>
    %20 = arith.mulf %19, %18 : vector<8x128xf32>
    %c0_21 = arith.constant 0 : index
    %c0_22 = arith.constant 0 : index
    %21 = vector.load %arg18[%c0_21, %c0_22] : memref<8x128xf32, #tpu.memory_space<vmem>>, vector<8x128xf32>
    %22 = vector.broadcast %17 : vector<8x1xf32> to vector<8x128xf32>
    %23 = arith.mulf %22, %21 : vector<8x128xf32>
    %c0_23 = arith.constant 0 : index
    %c0_24 = arith.constant 0 : index
    %c0_25 = arith.constant 0 : index
    %24 = vector.load %arg1[%c0_23, %c0_24, %c0_25] : memref<1x8x128xf32, #tpu.memory_space<vmem>>, vector<1x8x128xf32>
    %25 = vector.shape_cast %24 : vector<1x8x128xf32> to vector<8x128xf32>
    %26 = tpu.concatenate %25, %20 in 1 : vector<8x128xf32>, vector<8x128xf32> -> vector<8x256xf32>
    %cst = arith.constant dense<0.000000e+00> : vector<8x512xf32>
    %27 = tpu.matmul %26, %3, %cst {dimension_numbers = #tpu.dot_dimension_numbers<[1], [0], [0], [1], [0, 0, 1, 1], [], []>} : vector<8x256xf32>, vector<256x512xf32>, vector<8x512xf32> -> vector<8x512xf32>
    %28 = vector.broadcast %4 : vector<1x512xf32> to vector<8x512xf32>
    %29 = arith.addf %27, %28 : vector<8x512xf32>
    %30 = vector.extract_strided_slice %29 {offsets = [0, 0], sizes = [8, 256], strides = [1, 1]} : vector<8x512xf32> to vector<8x256xf32>
    %31 = arith.negf %30 : vector<8x256xf32>
    %32 = math.exp %31 : vector<8x256xf32>
    %cst_26 = arith.constant 1.000000e+00 : f32
    %33 = vector.broadcast %cst_26 : f32 to vector<8x256xf32>
    %34 = arith.addf %33, %32 : vector<8x256xf32>
    %35 = arith.divf %33, %34 : vector<8x256xf32>
    %36 = vector.extract_strided_slice %29 {offsets = [0, 256], sizes = [8, 128], strides = [1, 1]} : vector<8x512xf32> to vector<8x128xf32>
    %37 = math.tanh %36 : vector<8x128xf32>
    %38 = vector.extract_strided_slice %29 {offsets = [0, 384], sizes = [8, 128], strides = [1, 1]} : vector<8x512xf32> to vector<8x128xf32>
    %39 = arith.negf %38 : vector<8x128xf32>
    %40 = math.exp %39 : vector<8x128xf32>
    %cst_27 = arith.constant 1.000000e+00 : f32
    %41 = vector.broadcast %cst_27 : f32 to vector<8x128xf32>
    %42 = arith.addf %41, %40 : vector<8x128xf32>
    %43 = arith.divf %41, %42 : vector<8x128xf32>
    %44 = vector.extract_strided_slice %35 {offsets = [0, 0], sizes = [8, 128], strides = [1, 1]} : vector<8x256xf32> to vector<8x128xf32>
    %45 = vector.extract_strided_slice %35 {offsets = [0, 128], sizes = [8, 128], strides = [1, 1]} : vector<8x256xf32> to vector<8x128xf32>
    %46 = arith.mulf %45, %23 : vector<8x128xf32>
    %47 = arith.mulf %44, %37 : vector<8x128xf32>
    %48 = arith.addf %46, %47 : vector<8x128xf32>
    %49 = math.tanh %48 : vector<8x128xf32>
    %50 = arith.mulf %43, %49 : vector<8x128xf32>
    %c0_28 = arith.constant 0 : index
    %c0_29 = arith.constant 0 : index
    %51 = vector.load %arg17[%c0_28, %c0_29] : memref<8x128xf32, #tpu.memory_space<vmem>>, vector<8x128xf32>
    tpu.vector_store %arg17[%c0_28, %c0_29], %50 {strides = array<i32>} : memref<8x128xf32, #tpu.memory_space<vmem>>, vector<8x128xf32>,
    %c0_30 = arith.constant 0 : index
    %c0_31 = arith.constant 0 : index
    %52 = vector.load %arg18[%c0_30, %c0_31] : memref<8x128xf32, #tpu.memory_space<vmem>>, vector<8x128xf32>
    tpu.vector_store %arg18[%c0_30, %c0_31], %48 {strides = array<i32>} : memref<8x128xf32, #tpu.memory_space<vmem>>, vector<8x128xf32>,
    %c0_32 = arith.constant 0 : index
    %c0_33 = arith.constant 0 : index
    %c0_34 = arith.constant 0 : index
    %53 = vector.load %arg15[%c0_32, %c0_33, %c0_34] : memref<1x8x128xf32, #tpu.memory_space<vmem>>, vector<1x8x128xf32>
    %54 = vector.shape_cast %53 : vector<1x8x128xf32> to vector<8x128xf32>
    %55 = vector.shape_cast %50 : vector<8x128xf32> to vector<1x8x128xf32>
    tpu.vector_store %arg15[%c0_32, %c0_33, %c0_34], %55 {strides = array<i32>} : memref<1x8x128xf32, #tpu.memory_space<vmem>>, vector<1x8x128xf32>,
    %c0_35 = arith.constant 0 : index
    %c0_36 = arith.constant 0 : index
    %c0_37 = arith.constant 0 : index
    %56 = vector.load %arg16[%c0_35, %c0_36, %c0_37] : memref<1x8x128xf32, #tpu.memory_space<vmem>>, vector<1x8x128xf32>
    %57 = vector.shape_cast %56 : vector<1x8x128xf32> to vector<8x128xf32>
    %58 = vector.shape_cast %48 : vector<8x128xf32> to vector<1x8x128xf32>
    tpu.vector_store %arg16[%c0_35, %c0_36, %c0_37], %58 {strides = array<i32>} : memref<1x8x128xf32, #tpu.memory_space<vmem>>, vector<1x8x128xf32>,
    %c0_38 = arith.constant 0 : index
    %c0_39 = arith.constant 0 : index
    %c0_40 = arith.constant 0 : index
    %59 = vector.load %arg2[%c0_38, %c0_39, %c0_40] : memref<1x8x32xf32, #tpu.memory_space<vmem>>, vector<1x8x32xf32>
    %60 = vector.shape_cast %59 : vector<1x8x32xf32> to vector<8x32xf32>
    %cst_41 = arith.constant dense<0.000000e+00> : vector<8x128xf32>
    %61 = tpu.matmul %60, %5, %cst_41 {dimension_numbers = #tpu.dot_dimension_numbers<[1], [0], [0], [1], [0, 0, 1, 1], [], []>} : vector<8x32xf32>, vector<32x128xf32>, vector<8x128xf32> -> vector<8x128xf32>
    %62 = arith.mulf %61, %50 : vector<8x128xf32>
    %cst_42 = arith.constant dense<0.000000e+00> : vector<8x128xf32>
    %63 = tpu.matmul %62, %6, %cst_42 {dimension_numbers = #tpu.dot_dimension_numbers<[1], [0], [0], [1], [0, 0, 1, 1], [], []>} : vector<8x128xf32>, vector<128x128xf32>, vector<8x128xf32> -> vector<8x128xf32>
    %c4_i32_43 = arith.constant 4 : i32
    %64 = vector.broadcast %c4_i32_43 : i32 to vector<8x128xi32>
    %65 = arith.cmpi slt, %11, %64 : vector<8x128xi32>
    %cst_44 = arith.constant -1.000000e+30 : f32
    %66 = vector.broadcast %cst_44 : f32 to vector<8x128xf32>
    %67 = arith.select %65, %63, %66 : vector<8x128xi1>, vector<8x128xf32>
    %cst_45 = arith.constant dense<0xFF800000> : vector<8xf32>
    %68 = vector.multi_reduction <maximumf>, %67, %cst_45 [1] : vector<8x128xf32> to vector<8xf32>
    %69 = vector.shape_cast %68 : vector<8xf32> to vector<8x1xf32>
    %70 = vector.broadcast %69 : vector<8x1xf32> to vector<8x128xf32>
    %71 = arith.subf %67, %70 : vector<8x128xf32>
    %72 = math.exp %71 : vector<8x128xf32>
    %cst_46 = arith.constant dense<0.000000e+00> : vector<8xf32>
    %73 = vector.multi_reduction <add>, %72, %cst_46 [1] : vector<8x128xf32> to vector<8xf32>
    %74 = vector.shape_cast %73 : vector<8xf32> to vector<8x1xf32>
    %75 = vector.broadcast %74 : vector<8x1xf32> to vector<8x128xf32>
    %76 = arith.divf %72, %75 : vector<8x128xf32>
    %cst_47 = arith.constant dense<0.000000e+00> : vector<8x128xf32>
    %77 = tpu.matmul %50, %7, %cst_47 {dimension_numbers = #tpu.dot_dimension_numbers<[1], [0], [0], [1], [0, 0, 1, 1], [], []>} : vector<8x128xf32>, vector<128x128xf32>, vector<8x128xf32> -> vector<8x128xf32>
    %78 = vector.broadcast %8 : vector<1x128xf32> to vector<8x128xf32>
    %79 = arith.addf %77, %78 : vector<8x128xf32>
    %cst_48 = arith.constant 0.000000e+00 : f32
    %80 = vector.broadcast %cst_48 : f32 to vector<8x128xf32>
    %81 = arith.maximumf %79, %80 : vector<8x128xf32>
    %82 = vector.broadcast %9 : vector<1x128xf32> to vector<8x128xf32>
    %83 = arith.mulf %81, %82 : vector<8x128xf32>
    %cst_49 = arith.constant dense<0.000000e+00> : vector<8xf32>
    %84 = vector.multi_reduction <add>, %83, %cst_49 [1] : vector<8x128xf32> to vector<8xf32>
    %85 = vector.shape_cast %84 : vector<8xf32> to vector<8x1xf32>
    %86 = vector.broadcast %10 : vector<1x1xf32> to vector<8x1xf32>
    %87 = arith.addf %85, %86 : vector<8x1xf32>
    %88 = vector.broadcast %87 : vector<8x1xf32> to vector<8x128xf32>
    %89 = arith.mulf %88, %15 : vector<8x128xf32>
    %90 = arith.addf %76, %89 : vector<8x128xf32>
    %c0_50 = arith.constant 0 : index
    %c0_51 = arith.constant 0 : index
    %c0_52 = arith.constant 0 : index
    %91 = vector.load %arg14[%c0_50, %c0_51, %c0_52] : memref<1x8x128xf32, #tpu.memory_space<vmem>>, vector<1x8x128xf32>
    %92 = vector.shape_cast %91 : vector<1x8x128xf32> to vector<8x128xf32>
    %93 = vector.shape_cast %90 : vector<8x128xf32> to vector<1x8x128xf32>
    tpu.vector_store %arg14[%c0_50, %c0_51, %c0_52], %93 {strides = array<i32>} : memref<1x8x128xf32, #tpu.memory_space<vmem>>, vector<1x8x128xf32>,
    return
  }
  func.func @transform_0(%arg0: i32) -> (i32, i32, i32) {
    %c0_i32 = arith.constant 0 : i32
    %c0_i32_0 = arith.constant 0 : i32
    %c0_i32_1 = arith.constant 0 : i32
    return %arg0, %c0_i32, %c0_i32_0 : i32, i32, i32
  }
  func.func @transform_1(%arg0: i32) -> (i32, i32, i32) {
    %c0_i32 = arith.constant 0 : i32
    %c0_i32_0 = arith.constant 0 : i32
    %c0_i32_1 = arith.constant 0 : i32
    return %arg0, %c0_i32, %c0_i32_0 : i32, i32, i32
  }
  func.func @transform_2(%arg0: i32) -> (i32, i32, i32) {
    %c0_i32 = arith.constant 0 : i32
    %c0_i32_0 = arith.constant 0 : i32
    %c0_i32_1 = arith.constant 0 : i32
    return %arg0, %c0_i32, %c0_i32_0 : i32, i32, i32
  }
  func.func @transform_3(%arg0: i32) -> (i32, i32) {
    %c0_i32 = arith.constant 0 : i32
    %c0_i32_0 = arith.constant 0 : i32
    %c0_i32_1 = arith.constant 0 : i32
    return %c0_i32, %c0_i32_0 : i32, i32
  }
  func.func @transform_4(%arg0: i32) -> (i32, i32) {
    %c0_i32 = arith.constant 0 : i32
    %c0_i32_0 = arith.constant 0 : i32
    %c0_i32_1 = arith.constant 0 : i32
    return %c0_i32, %c0_i32_0 : i32, i32
  }
  func.func @transform_5(%arg0: i32) -> (i32, i32) {
    %c0_i32 = arith.constant 0 : i32
    %c0_i32_0 = arith.constant 0 : i32
    %c0_i32_1 = arith.constant 0 : i32
    return %c0_i32, %c0_i32_0 : i32, i32
  }
  func.func @transform_6(%arg0: i32) -> (i32, i32) {
    %c0_i32 = arith.constant 0 : i32
    %c0_i32_0 = arith.constant 0 : i32
    %c0_i32_1 = arith.constant 0 : i32
    return %c0_i32, %c0_i32_0 : i32, i32
  }
  func.func @transform_7(%arg0: i32) -> (i32, i32) {
    %c0_i32 = arith.constant 0 : i32
    %c0_i32_0 = arith.constant 0 : i32
    %c0_i32_1 = arith.constant 0 : i32
    return %c0_i32, %c0_i32_0 : i32, i32
  }
  func.func @transform_8(%arg0: i32) -> (i32, i32) {
    %c0_i32 = arith.constant 0 : i32
    %c0_i32_0 = arith.constant 0 : i32
    %c0_i32_1 = arith.constant 0 : i32
    return %c0_i32, %c0_i32_0 : i32, i32
  }
  func.func @transform_9(%arg0: i32) -> (i32, i32) {
    %c0_i32 = arith.constant 0 : i32
    %c0_i32_0 = arith.constant 0 : i32
    %c0_i32_1 = arith.constant 0 : i32
    return %c0_i32, %c0_i32_0 : i32, i32
  }
  func.func @transform_10(%arg0: i32) -> (i32, i32) {
    %c0_i32 = arith.constant 0 : i32
    %c0_i32_0 = arith.constant 0 : i32
    %c0_i32_1 = arith.constant 0 : i32
    return %c0_i32, %c0_i32_0 : i32, i32
  }
  func.func @transform_11(%arg0: i32) -> (i32, i32) {
    %c0_i32 = arith.constant 0 : i32
    %c0_i32_0 = arith.constant 0 : i32
    %c0_i32_1 = arith.constant 0 : i32
    return %c0_i32, %c0_i32_0 : i32, i32
  }
  func.func @transform_12(%arg0: i32) -> (i32, i32) {
    %c0_i32 = arith.constant 0 : i32
    %c0_i32_0 = arith.constant 0 : i32
    %c0_i32_1 = arith.constant 0 : i32
    return %c0_i32, %c0_i32_0 : i32, i32
  }
  func.func @transform_13(%arg0: i32) -> (i32, i32, i32) {
    %c0_i32 = arith.constant 0 : i32
    %c0_i32_0 = arith.constant 0 : i32
    %c0_i32_1 = arith.constant 0 : i32
    return %arg0, %c0_i32, %c0_i32_0 : i32, i32, i32
  }
  func.func @transform_14(%arg0: i32) -> (i32, i32, i32) {
    %c0_i32 = arith.constant 0 : i32
    %c0_i32_0 = arith.constant 0 : i32
    %c0_i32_1 = arith.constant 0 : i32
    return %arg0, %c0_i32, %c0_i32_0 : i32, i32, i32
  }
  func.func @transform_15(%arg0: i32) -> (i32, i32, i32) {
    %c0_i32 = arith.constant 0 : i32
    %c0_i32_0 = arith.constant 0 : i32
    %c0_i32_1 = arith.constant 0 : i32
    return %arg0, %c0_i32, %c0_i32_0 : i32, i32, i32
  }
}

</mosaic_0001>

<bundles_post_ra>
// kernel: tpu_custom_call.1
= control target key start
LH: loop header
LB: loop body
LE: loop exit
PB: predicated region body
PF: predicated region fallthrough
CT: control target
= control target key end

     0   :  { %s1683_s0 = inlined_call_operand.hbm [shape: f32[1,8,128], index: 0, kind: input, shape index: {}]   ;;  %s1684_s1 = inlined_call_operand.hbm [shape: f32[1,8,32], index: 1, kind: input, shape index: {}]   ;;  %s1685_s2 = inlined_call_operand.vmem [shape: f32[1,8,1], index: 2, kind: input, shape index: {}]   ;;  %s1686_s3 = inlined_call_operand.hbm [shape: f32[8,128], index: 3, kind: input, shape index: {}]   ;;  %s1687_s4 = inlined_call_operand.hbm [shape: f32[8,128], index: 4, kind: input, shape index: {}]   ;;  %s1688_s5 = inlined_call_operand.hbm [shape: f32[256,512], index: 5, kind: input, shape index: {}]   ;;  %s1689_s6 = inlined_call_operand.vmem [shape: f32[1,512], index: 6, kind: input, shape index: {}]   ;;  %s1690_s7 = inlined_call_operand.vmem [shape: f32[32,128], index: 7, kind: input, shape index: {}]   ;;  %s1691_s8 = inlined_call_operand.hbm [shape: f32[128,128], index: 8, kind: input, shape index: {}]   ;;  %s1692_s9 = inlined_call_operand.hbm [shape: f32[128,128], index: 9, kind: input, shape index: {}]   ;;  %s1693_s10 = inlined_call_operand.vmem [shape: f32[1,128], index: 10, kind: input, shape index: {}]   ;;  %s1694_s11 = inlined_call_operand.vmem [shape: f32[1,128], index: 11, kind: input, shape index: {}]   ;;  %s1695_s12 = inlined_call_operand.<no memory space> [shape: f32[1,1], index: 12, kind: input, shape index: {}]   ;;  %s1696_s13 = inlined_call_operand.hbm [shape: f32[1,8,128], index: 13, kind: output, shape index: {0}]   ;;  %s1697_s14 = inlined_call_operand.hbm [shape: f32[1,8,128], index: 14, kind: output, shape index: {1}]   ;;  %s1698_s15 = inlined_call_operand.hbm [shape: f32[1,8,128], index: 15, kind: output, shape index: {2}]  }
   0x1   :  { %v21_v0 = vstv %s1695_s12 }
   0x2   :  { %22 = vst [vmem:[#allocation4] sm:$0x1] %v21_v0 }
   0x3   :  { %23 = vsyncpa [#allocation6], 0 }
   0x4   :  { %24 = vsyncpa [#allocation9], 0 }
   0x5   :  { %25 = vsyncpa [#allocation12], 0 }
   0x6   :  { %26 = vsyncpa [#allocation15], 0 }
   0x7   :  { %27 = vsyncpa [#allocation7], 0 }
   0x8   :  { %28 = vsyncpa [#allocation19], 0  ;;  %s1406_s20 = smov [#allocation8]   ;;  %s1407_s22 = smov [#allocation11]  }
   0x9   :  { %s45_s21 = sshll.u32 %s1406_s20, 4  ;;  %s67_s23 = sshll.u32 %s1407_s22, 4  ;;  %s46_s21 = int_to_ptr.vmem [resolvable:$true] %s45_s21  ;;  %s68_s23 = int_to_ptr.vmem [resolvable:$true] %s67_s23 }
   0xa   :  { %s1174_s26 = scalar_lea.hbm %s1684_s1, 128 }
   0xb   :  { %p1175_p0 = scmp.ne.s32.totalorder %s1684_s1, %s1174_s26  ;;  %p1178_p1 = scmp.lt.u32.totalorder %s1174_s26, %s1684_s1 }
   0xd   :  { %p1180_p2 = pnand %p1178_p1, %p1175_p0 }
   0xf   :  { %1183 = shalt.err (!%p1180_p2)
}
  0x10   :  { %s1184_s30 = scalar_lea.vmem %s46_s21, 128  ;;  %p1189_p4 = scmp.lt.s32.totalorder %s46_s21, %s46_s21 }
  0x11   :  { %p1185_p3 = scmp.ne.s32.totalorder %s46_s21, %s1184_s30  ;;  %p1190_p5 = scmp.lt.s32.totalorder %s1184_s30, %s1184_s30 }
  0x13   :  { %p1191_p6 = por %p1190_p5, %p1189_p4 }
  0x15   :  { %p1192_p7 = pnand %p1191_p6, %p1185_p3 }
  0x17   :  { %1195 = shalt.err (!%p1192_p7)
}
  0x18   :  { %48 = dma.hbm_to_vmem [thread:$0]  %s1684_s1, 128, %s46_s21, [#allocation9]  }
  0x19   :  { %s1196_s20 = scalar_lea.hbm %s1687_s4, 128 }
  0x1a   :  { %p1197_p8 = scmp.ne.s32.totalorder %s1687_s4, %s1196_s20  ;;  %p1200_p9 = scmp.lt.u32.totalorder %s1196_s20, %s1687_s4 }
  0x1c   :  { %p1202_p10 = pnand %p1200_p9, %p1197_p8 }
  0x1e   :  { %1205 = shalt.err (!%p1202_p10)
}
  0x1f   :  { %s1206_s27 = scalar_lea.vmem %s68_s23, 128  ;;  %p1211_p12 = scmp.lt.s32.totalorder %s68_s23, %s68_s23 }
  0x20   :  { %p1207_p11 = scmp.ne.s32.totalorder %s68_s23, %s1206_s27  ;;  %p1212_p13 = scmp.lt.s32.totalorder %s1206_s27, %s1206_s27 }
  0x22   :  { %p1213_p0 = por %p1212_p13, %p1211_p12 }
  0x24   :  { %p1214_p1 = pnand %p1213_p0, %p1207_p11 }
  0x26   :  { %1217 = shalt.err (!%p1214_p1)
}
  0x27   :  { %70 = dma.hbm_to_vmem [thread:$0]  %s1687_s4, 128, %s68_s23, [#allocation12]  }
  0x28   :  { %s1408_s28 = smov [#allocation14]   ;;  %s1218_s16 = scalar_lea.hbm %s1691_s8, 2048 }
  0x29   :  { %s92_s12 = sshll.u32 %s1408_s28, 4  ;;  %p1219_p2 = scmp.ne.s32.totalorder %s1691_s8, %s1218_s16  ;;  %s93_s12 = int_to_ptr.vmem [resolvable:$true] %s92_s12 }
  0x2a   :  { %p1222_p3 = scmp.lt.u32.totalorder %s1218_s16, %s1691_s8 }
  0x2c   :  { %p1224_p4 = pnand %p1222_p3, %p1219_p2 }
  0x2e   :  { %1227 = shalt.err (!%p1224_p4)
}
  0x2f   :  { %s1228_s22 = scalar_lea.vmem %s93_s12, 2048  ;;  %p1233_p6 = scmp.lt.s32.totalorder %s93_s12, %s93_s12 }
  0x30   :  { %p1229_p5 = scmp.ne.s32.totalorder %s93_s12, %s1228_s22  ;;  %p1234_p7 = scmp.lt.s32.totalorder %s1228_s22, %s1228_s22 }
  0x32   :  { %p1235_p8 = por %p1234_p7, %p1233_p6 }
  0x34   :  { %p1236_p9 = pnand %p1235_p8, %p1229_p5 }
  0x36   :  { %1239 = shalt.err (!%p1236_p9)
}
  0x37   :  { %s1409_s4 = smov 128   ;;  %s1410_s23 = smov 8  }
  0x38   :  { %98 = dma.hbm_to_vmem [thread:$0]  %s1691_s8, 2048, %s93_s12, [#allocation15], %s1409_s4, %s1409_s4, %s1410_s23  }
  0x39   :  { %s1411_s26 = smov [#allocation5]   ;;  %s1412_s1 = smov [#allocation10]  }
  0x3a   :  { %s35_s27 = sshll.u32 %s1411_s26, 4  ;;  %s57_s21 = sshll.u32 %s1412_s1, 4  ;;  %s36_s27 = int_to_ptr.vmem [resolvable:$true] %s35_s27  ;;  %s58_s21 = int_to_ptr.vmem [resolvable:$true] %s57_s21 }
  0x3b   :  { %s1240_s30 = scalar_lea.hbm %s1683_s0, 128 }
  0x3c   :  { %p1241_p10 = scmp.ne.s32.totalorder %s1683_s0, %s1240_s30  ;;  %p1244_p11 = scmp.lt.u32.totalorder %s1240_s30, %s1683_s0 }
  0x3e   :  { %p1246_p12 = pnand %p1244_p11, %p1241_p10 }
  0x40   :  { %1249 = shalt.err (!%p1246_p12)
}
  0x41   :  { %s1250_s8 = scalar_lea.vmem %s36_s27, 128  ;;  %p1255_p0 = scmp.lt.s32.totalorder %s36_s27, %s36_s27 }
  0x42   :  { %p1251_p13 = scmp.ne.s32.totalorder %s36_s27, %s1250_s8  ;;  %p1256_p1 = scmp.lt.s32.totalorder %s1250_s8, %s1250_s8 }
  0x44   :  { %p1257_p2 = por %p1256_p1, %p1255_p0 }
  0x46   :  { %p1258_p3 = pnand %p1257_p2, %p1251_p13 }
  0x48   :  { %1261 = shalt.err (!%p1258_p3)
}
  0x49   :  { %38 = dma.hbm_to_vmem [thread:$0]  %s1683_s0, 128, %s36_s27, [#allocation6]  }
  0x4a   :  { %s1262_s25 = scalar_lea.hbm %s1686_s3, 128 }
  0x4b   :  { %p1263_p4 = scmp.ne.s32.totalorder %s1686_s3, %s1262_s25  ;;  %p1266_p5 = scmp.lt.u32.totalorder %s1262_s25, %s1686_s3 }
  0x4d   :  { %p1268_p6 = pnand %p1266_p5, %p1263_p4 }
  0x4f   :  { %1271 = shalt.err (!%p1268_p6)
}
  0x50   :  { %s1272_s30 = scalar_lea.vmem %s58_s21, 128  ;;  %p1277_p8 = scmp.lt.s32.totalorder %s58_s21, %s58_s21 }
  0x51   :  { %p1273_p7 = scmp.ne.s32.totalorder %s58_s21, %s1272_s30  ;;  %p1278_p9 = scmp.lt.s32.totalorder %s1272_s30, %s1272_s30 }
  0x53   :  { %p1279_p10 = por %p1278_p9, %p1277_p8 }
  0x55   :  { %p1280_p11 = pnand %p1279_p10, %p1273_p7 }
  0x57   :  { %1283 = shalt.err (!%p1280_p11)
}
  0x58   :  { %60 = dma.hbm_to_vmem [thread:$0]  %s1686_s3, 128, %s58_s21, [#allocation9]  }
  0x59   :  { %s1413_s16 = smov [#allocation13]   ;;  %s1284_s8 = scalar_lea.hbm %s1688_s5, 16384 }
  0x5a   :  { %s76_s17 = sshll.u32 %s1413_s16, 4  ;;  %p1285_p12 = scmp.ne.s32.totalorder %s1688_s5, %s1284_s8  ;;  %s77_s17 = int_to_ptr.vmem [resolvable:$true] %s76_s17 }
  0x5b   :  { %p1288_p13 = scmp.lt.u32.totalorder %s1284_s8, %s1688_s5 }
  0x5d   :  { %p1290_p0 = pnand %p1288_p13, %p1285_p12 }
  0x5f   :  { %1293 = shalt.err (!%p1290_p0)
}
  0x60   :  { %s1294_s25 = scalar_lea.vmem %s77_s17, 16384  ;;  %p1299_p2 = scmp.lt.s32.totalorder %s77_s17, %s77_s17 }
  0x61   :  { %p1295_p1 = scmp.ne.s32.totalorder %s77_s17, %s1294_s25  ;;  %p1300_p3 = scmp.lt.s32.totalorder %s1294_s25, %s1294_s25 }
  0x63   :  { %p1301_p4 = por %p1300_p3, %p1299_p2 }
  0x65   :  { %p1302_p5 = pnand %p1301_p4, %p1295_p1 }
  0x67   :  { %1305 = shalt.err (!%p1302_p5)
}
  0x68   :  { %s1414_s3 = smov 512   ;;  %s1415_s21 = smov 32  }
  0x69   :  { %82 = dma.hbm_to_vmem [thread:$0]  %s1688_s5, 16384, %s77_s17, [#allocation12], %s1414_s3, %s1414_s3, %s1415_s21  }
  0x6a   :  { %s1416_s28 = smov [#allocation16]   ;;  %s1306_s27 = scalar_lea.hbm %s1692_s9, 2048 }
  0x6b   :  { %s104_s29 = sshll.u32 %s1416_s28, 4  ;;  %p1307_p6 = scmp.ne.s32.totalorder %s1692_s9, %s1306_s27  ;;  %s105_s29 = int_to_ptr.vmem [resolvable:$true] %s104_s29 }
  0x6c   :  { %p1310_p7 = scmp.lt.u32.totalorder %s1306_s27, %s1692_s9 }
  0x6e   :  { %p1312_p8 = pnand %p1310_p7, %p1307_p6 }
  0x70   :  { %1315 = shalt.err (!%p1312_p8)
}
  0x71   :  { %s1316_s12 = scalar_lea.vmem %s105_s29, 2048  ;;  %p1321_p10 = scmp.lt.s32.totalorder %s105_s29, %s105_s29 }
  0x72   :  { %p1317_p9 = scmp.ne.s32.totalorder %s105_s29, %s1316_s12  ;;  %p1322_p11 = scmp.lt.s32.totalorder %s1316_s12, %s1316_s12 }
  0x74   :  { %p1323_p12 = por %p1322_p11, %p1321_p10 }
  0x76   :  { %p1324_p13 = pnand %p1323_p12, %p1317_p9 }
  0x78   :  { %1327 = shalt.err (!%p1324_p13)
}
  0x79   :  { %110 = dma.hbm_to_vmem [thread:$0]  %s1692_s9, 2048, %s105_s29, [#allocation15], %s1409_s4, %s1409_s4, %s1410_s23  }
  0x7a   :  { %1394 = dma.done.wait [#allocation6], 128  }
  0x7b   :  { %1395 = vsyncadd [#allocation6], 4294967168 }
  0x7c   :  { %1396 = dma.done.wait [#allocation9], 256  }
  0x7d   :  { %1397 = vsyncadd [#allocation9], 4294967040 }
  0x7e   :  { %1398 = dma.done.wait [#allocation12], 16512  }
  0x7f   :  { %1399 = vsyncadd [#allocation12], 4294950784 }
  0x80   :  { %1400 = dma.done.wait [#allocation15], 4096  }
  0x81   :  { %1401 = vsyncadd [#allocation15], 4294963200  ;;  %v1417_v1 = vmov 0   ;;  %v319_v2 = vld [vmem:[%s1685_s2] sm:$0xff]  ;;  %v147_v3 = vld [vmem:[#allocation13 + $0x8] sm:$0xff]  ;;  %vm1419_vm0 = vmmov 0  }
  0x82   :  { %1152 = vset.pattern.permute.xlu0 %v1417_v1  ;;  %1153 = vset.pattern.permute.xlu1 %v1417_v1  ;;  %v151_v4 = vld [vmem:[#allocation13 + $0x28] sm:$0xff]  ;;  %v146_v6 = vld [vmem:[#allocation13] sm:$0xff]  ;;  %v149_v22 = vld [vmem:[#allocation13 + $0x18] sm:$0xff]  ;;  %vm522_vm1 = vcmask 261120  }
  0x83   :  { %323 = vperm.xlu0 %1152, %v319_v2   ;;  %v952_v5 = vpack.c.bf16 %v151_v4, %v147_v3  ;;  %v150_v7 = vld [vmem:[#allocation13 + $0x20] sm:$0xff]  ;;  %v155_v8 = vld [vmem:[#allocation13 + $0x48] sm:$0xff]  ;;  %v153_v23 = vld [vmem:[#allocation13 + $0x38] sm:$0xff] }
  0x84   :  { %v954_v9 = vpack.c.bf16 %v150_v7, %v146_v6  ;;  %v159_v10 = vld [vmem:[#allocation13 + $0x68] sm:$0xff]  ;;  %v154_v11 = vld [vmem:[#allocation13 + $0x40] sm:$0xff]  ;;  %v148_v24 = vld [vmem:[#allocation13 + $0x10] sm:$0xff]  ;;  %v1016_v26 = vpack.c.bf16 %v153_v23, %v149_v22 }
  0x85   :  { %v158_v12 = vld [vmem:[#allocation13 + $0x60] sm:$0xff]  ;;  %953 = vmatprep.subr.bf16.mxu0 %v952_v5  ;;  %v956_v13 = vpack.c.bf16 %v159_v10, %v155_v8  ;;  %v163_v14 = vld [vmem:[#allocation13 + $0x88] sm:$0xff]  ;;  %v152_v25 = vld [vmem:[#allocation13 + $0x30] sm:$0xff] }
  0x86   :  { %v167_v15 = vld [vmem:[#allocation13 + $0xa8] sm:$0xff]  ;;  %955 = vmatpush1.bf16.msra.mxu0 %v954_v9  ;;  %v958_v16 = vpack.c.bf16 %v158_v12, %v154_v11  ;;  %v162_v17 = vld [vmem:[#allocation13 + $0x80] sm:$0xff]  ;;  %v1018_v27 = vpack.c.bf16 %v152_v25, %v148_v24  ;;  %v157_v30 = vld [vmem:[#allocation13 + $0x58] sm:$0xff]  ;;  %1017 = vmatprep.subr.bf16.mxu1 %v1016_v26 }
  0x87   :  { %v166_v18 = vld [vmem:[#allocation13 + $0xa0] sm:$0xff]  ;;  %957 = vmatprep.subr.bf16.mxu0 %v956_v13  ;;  %v960_v19 = vpack.c.bf16 %v167_v15, %v163_v14  ;;  %v171_v20 = vld [vmem:[#allocation13 + $0xc8] sm:$0xff]  ;;  %v161_v31 = vld [vmem:[#allocation13 + $0x78] sm:$0xff] }
  0x88   :  { %v175_v21 = vld [vmem:[#allocation13 + $0xe8] sm:$0xff]  ;;  %v962_v28 = vpack.c.bf16 %v166_v18, %v162_v17  ;;  %v170_v29 = vld [vmem:[#allocation13 + $0xc0] sm:$0xff]  ;;  %v1020_v34 = vpack.c.bf16 %v161_v31, %v157_v30  ;;  %v156_v35 = vld [vmem:[#allocation13 + $0x50] sm:$0xff]  ;;  %1019 = vmatpush1.bf16.msra.mxu1 %v1018_v27 }
  0x89   :  { %v964_v32 = vpack.c.bf16 %v175_v21, %v171_v20  ;;  %v174_v33 = vld [vmem:[#allocation13 + $0xe0] sm:$0xff]  ;;  %v160_v36 = vld [vmem:[#allocation13 + $0x70] sm:$0xff]  ;;  %v179_v37 = vld [vmem:[#allocation13 + $0x108] sm:$0xff] }
  0x8a   :  { %959 = vmatpush1.bf16.msra.mxu0 %v958_v16  ;;  %v183_v38 = vld [vmem:[#allocation13 + $0x128] sm:$0xff]  ;;  %v1022_v39 = vpack.c.bf16 %v160_v36, %v156_v35  ;;  %1021 = vmatprep.subr.bf16.mxu1 %v1020_v34  ;;  %v165_v40 = vld [vmem:[#allocation13 + $0x98] sm:$0xff]  ;;  %v164_v42 = vld [vmem:[#allocation13 + $0x90] sm:$0xff]  ;;  %v966_v43 = vpack.c.bf16 %v174_v33, %v170_v29 }
  0x8b   :  { %961 = vmatprep.subr.bf16.mxu0 %v960_v19  ;;  %v169_v41 = vld [vmem:[#allocation13 + $0xb8] sm:$0xff]  ;;  %v168_v45 = vld [vmem:[#allocation13 + $0xb0] sm:$0xff]  ;;  %v968_v46 = vpack.c.bf16 %v183_v38, %v179_v37  ;;  %v178_v47 = vld [vmem:[#allocation13 + $0x100] sm:$0xff] }
  0x8c   :  { %v1024_v44 = vpack.c.bf16 %v169_v41, %v165_v40  ;;  %v182_v48 = vld [vmem:[#allocation13 + $0x120] sm:$0xff]  ;;  %v173_v49 = vld [vmem:[#allocation13 + $0xd8] sm:$0xff]  ;;  %1023 = vmatpush1.bf16.msra.mxu1 %v1022_v39  ;;  %v187_v50 = vld [vmem:[#allocation13 + $0x148] sm:$0xff]  ;;  %v1026_v52 = vpack.c.bf16 %v168_v45, %v164_v42 }
  0x8d   :  { %v191_v51 = vld [vmem:[#allocation13 + $0x168] sm:$0xff]  ;;  %v177_v53 = vld [vmem:[#allocation13 + $0xf8] sm:$0xff]  ;;  %v172_v55 = vld [vmem:[#allocation13 + $0xd0] sm:$0xff]  ;;  %v970_v57 = vpack.c.bf16 %v182_v48, %v178_v47 }
  0x8e   :  { %963 = vmatpush1.bf16.msra.mxu0 %v962_v28  ;;  %1025 = vmatprep.subr.bf16.mxu1 %v1024_v44  ;;  %v1028_v54 = vpack.c.bf16 %v177_v53, %v173_v49  ;;  %v176_v56 = vld [vmem:[#allocation13 + $0xf0] sm:$0xff]  ;;  %v181_v58 = vld [vmem:[#allocation13 + $0x118] sm:$0xff]  ;;  %v972_v60 = vpack.c.bf16 %v191_v51, %v187_v50  ;;  %v186_v61 = vld [vmem:[#allocation13 + $0x140] sm:$0xff] }
  0x8f   :  { %965 = vmatprep.subr.bf16.mxu0 %v964_v32  ;;  %v185_v59 = vld [vmem:[#allocation13 + $0x138] sm:$0xff]  ;;  %v190_v62 = vld [vmem:[#allocation13 + $0x160] sm:$0xff]  ;;  %v195_v63 = vld [vmem:[#allocation13 + $0x188] sm:$0xff]  ;;  %v1030_v1 = vpack.c.bf16 %v176_v56, %v172_v55 }
  0x90   :  { %1027 = vmatpush1.bf16.msra.mxu1 %v1026_v52  ;;  %v199_v0 = vld [vmem:[#allocation13 + $0x1a8] sm:$0xff]  ;;  %v1032_v2 = vpack.c.bf16 %v185_v59, %v181_v58  ;;  %v180_v3 = vld [vmem:[#allocation13 + $0x110] sm:$0xff]  ;;  %v974_v5 = vpack.c.bf16 %v190_v62, %v186_v61  ;;  %v189_v6 = vld [vmem:[#allocation13 + $0x158] sm:$0xff] }
  0x91   :  { %1029 = vmatprep.subr.bf16.mxu1 %v1028_v54  ;;  %v184_v4 = vld [vmem:[#allocation13 + $0x130] sm:$0xff]  ;;  %v193_v7 = vld [vmem:[#allocation13 + $0x178] sm:$0xff]  ;;  %v976_v8 = vpack.c.bf16 %v199_v0, %v195_v63  ;;  %v194_v9 = vld [vmem:[#allocation13 + $0x180] sm:$0xff] }
  0x92   :  { %967 = vmatpush1.bf16.msra.mxu0 %v966_v43  ;;  %v198_v10 = vld [vmem:[#allocation13 + $0x1a0] sm:$0xff]  ;;  %v203_v11 = vld [vmem:[#allocation13 + $0x1c8] sm:$0xff]  ;;  %v1034_v13 = vpack.c.bf16 %v184_v4, %v180_v3  ;;  %v1036_v14 = vpack.c.bf16 %v193_v7, %v189_v6  ;;  %v188_v15 = vld [vmem:[#allocation13 + $0x150] sm:$0xff] }
  0x93   :  { %969 = vmatprep.subr.bf16.mxu0 %v968_v46  ;;  %v207_v12 = vld [vmem:[#allocation13 + $0x1e8] sm:$0xff]  ;;  %v192_v16 = vld [vmem:[#allocation13 + $0x170] sm:$0xff]  ;;  %v978_v17 = vpack.c.bf16 %v198_v10, %v194_v9  ;;  %v197_v18 = vld [vmem:[#allocation13 + $0x198] sm:$0xff] }
  0x94   :  { %1031 = vmatpush1.bf16.msra.mxu1 %v1030_v1  ;;  %v201_v19 = vld [vmem:[#allocation13 + $0x1b8] sm:$0xff]  ;;  %v980_v20 = vpack.c.bf16 %v207_v12, %v203_v11  ;;  %v202_v21 = vld [vmem:[#allocation13 + $0x1c0] sm:$0xff]  ;;  %v211_v23 = vld [vmem:[#allocation13 + $0x208] sm:$0xff]  ;;  %v1038_v25 = vpack.c.bf16 %v192_v16, %v188_v15 }
  0x95   :  { %1033 = vmatprep.subr.bf16.mxu1 %v1032_v2  ;;  %v206_v22 = vld [vmem:[#allocation13 + $0x1e0] sm:$0xff]  ;;  %v215_v24 = vld [vmem:[#allocation13 + $0x228] sm:$0xff]  ;;  %v1040_v26 = vpack.c.bf16 %v201_v19, %v197_v18  ;;  %v196_v27 = vld [vmem:[#allocation13 + $0x190] sm:$0xff] }
  0x96   :  { %971 = vmatpush1.bf16.msra.mxu0 %v970_v57  ;;  %v200_v28 = vld [vmem:[#allocation13 + $0x1b0] sm:$0xff]  ;;  %v982_v29 = vpack.c.bf16 %v206_v22, %v202_v21  ;;  %v205_v30 = vld [vmem:[#allocation13 + $0x1d8] sm:$0xff]  ;;  %v984_v32 = vpack.c.bf16 %v215_v24, %v211_v23  ;;  %v210_v33 = vld [vmem:[#allocation13 + $0x200] sm:$0xff] }
  0x97   :  { %973 = vmatprep.subr.bf16.mxu0 %v972_v60  ;;  %v209_v31 = vld [vmem:[#allocation13 + $0x1f8] sm:$0xff]  ;;  %v214_v34 = vld [vmem:[#allocation13 + $0x220] sm:$0xff]  ;;  %v219_v35 = vld [vmem:[#allocation13 + $0x248] sm:$0xff]  ;;  %v1042_v37 = vpack.c.bf16 %v200_v28, %v196_v27 }
  0x98   :  { %1035 = vmatpush1.bf16.msra.mxu1 %v1034_v13  ;;  %v223_v36 = vld [vmem:[#allocation13 + $0x268] sm:$0xff]  ;;  %v1044_v38 = vpack.c.bf16 %v209_v31, %v205_v30  ;;  %v204_v39 = vld [vmem:[#allocation13 + $0x1d0] sm:$0xff]  ;;  %v986_v41 = vpack.c.bf16 %v214_v34, %v210_v33  ;;  %v213_v42 = vld [vmem:[#allocation13 + $0x218] sm:$0xff] }
  0x99   :  { %1037 = vmatprep.subr.bf16.mxu1 %v1036_v14  ;;  %v208_v40 = vld [vmem:[#allocation13 + $0x1f0] sm:$0xff]  ;;  %v217_v43 = vld [vmem:[#allocation13 + $0x238] sm:$0xff]  ;;  %v988_v44 = vpack.c.bf16 %v223_v36, %v219_v35  ;;  %v218_v45 = vld [vmem:[#allocation13 + $0x240] sm:$0xff] }
  0x9a   :  { %975 = vmatpush1.bf16.msra.mxu0 %v974_v5  ;;  %v222_v46 = vld [vmem:[#allocation13 + $0x260] sm:$0xff]  ;;  %v227_v47 = vld [vmem:[#allocation13 + $0x288] sm:$0xff]  ;;  %v1046_v49 = vpack.c.bf16 %v208_v40, %v204_v39  ;;  %v1048_v50 = vpack.c.bf16 %v217_v43, %v213_v42  ;;  %v212_v51 = vld [vmem:[#allocation13 + $0x210] sm:$0xff] }
  0x9b   :  { %977 = vmatprep.subr.bf16.mxu0 %v976_v8  ;;  %v231_v48 = vld [vmem:[#allocation13 + $0x2a8] sm:$0xff]  ;;  %v216_v52 = vld [vmem:[#allocation13 + $0x230] sm:$0xff]  ;;  %v990_v53 = vpack.c.bf16 %v222_v46, %v218_v45  ;;  %v221_v54 = vld [vmem:[#allocation13 + $0x258] sm:$0xff] }
  0x9c   :  { %1039 = vmatpush1.bf16.msra.mxu1 %v1038_v25  ;;  %v225_v55 = vld [vmem:[#allocation13 + $0x278] sm:$0xff]  ;;  %v992_v56 = vpack.c.bf16 %v231_v48, %v227_v47  ;;  %v226_v57 = vld [vmem:[#allocation13 + $0x280] sm:$0xff]  ;;  %v235_v59 = vld [vmem:[#allocation13 + $0x2c8] sm:$0xff]  ;;  %v1050_v61 = vpack.c.bf16 %v216_v52, %v212_v51 }
  0x9d   :  { %1041 = vmatprep.subr.bf16.mxu1 %v1040_v26  ;;  %v230_v58 = vld [vmem:[#allocation13 + $0x2a0] sm:$0xff]  ;;  %v239_v60 = vld [vmem:[#allocation13 + $0x2e8] sm:$0xff]  ;;  %v1052_v62 = vpack.c.bf16 %v225_v55, %v221_v54  ;;  %v220_v63 = vld [vmem:[#allocation13 + $0x250] sm:$0xff] }
  0x9e   :  { %979 = vmatpush1.bf16.msra.mxu0 %v978_v17  ;;  %v224_v0 = vld [vmem:[#allocation13 + $0x270] sm:$0xff]  ;;  %v994_v1 = vpack.c.bf16 %v230_v58, %v226_v57  ;;  %v229_v2 = vld [vmem:[#allocation13 + $0x298] sm:$0xff]  ;;  %v996_v4 = vpack.c.bf16 %v239_v60, %v235_v59  ;;  %v234_v5 = vld [vmem:[#allocation13 + $0x2c0] sm:$0xff] }
  0x9f   :  { %981 = vmatprep.subr.bf16.mxu0 %v980_v20  ;;  %v233_v3 = vld [vmem:[#allocation13 + $0x2b8] sm:$0xff]  ;;  %v238_v6 = vld [vmem:[#allocation13 + $0x2e0] sm:$0xff]  ;;  %v243_v7 = vld [vmem:[#allocation13 + $0x308] sm:$0xff]  ;;  %v1054_v9 = vpack.c.bf16 %v224_v0, %v220_v63 }
  0xa0   :  { %1043 = vmatpush1.bf16.msra.mxu1 %v1042_v37  ;;  %v247_v8 = vld [vmem:[#allocation13 + $0x328] sm:$0xff]  ;;  %v1056_v10 = vpack.c.bf16 %v233_v3, %v229_v2  ;;  %v228_v11 = vld [vmem:[#allocation13 + $0x290] sm:$0xff]  ;;  %v998_v13 = vpack.c.bf16 %v238_v6, %v234_v5  ;;  %v237_v14 = vld [vmem:[#allocation13 + $0x2d8] sm:$0xff]  ;;  %v1418_v2 = vmov 0.0|0.0  }
  0xa1   :  { %1045 = vmatprep.subr.bf16.mxu1 %v1044_v38  ;;  %v232_v12 = vld [vmem:[#allocation13 + $0x2b0] sm:$0xff]  ;;  %v241_v15 = vld [vmem:[#allocation13 + $0x2f8] sm:$0xff]  ;;  %v1000_v16 = vpack.c.bf16 %v247_v8, %v243_v7  ;;  %v242_v17 = vld [vmem:[#allocation13 + $0x300] sm:$0xff] }
  0xa2   :  { %983 = vmatpush1.bf16.msra.mxu0 %v982_v29  ;;  %v246_v18 = vld [vmem:[#allocation13 + $0x320] sm:$0xff]  ;;  %v251_v19 = vld [vmem:[#allocation13 + $0x348] sm:$0xff]  ;;  %v1058_v21 = vpack.c.bf16 %v232_v12, %v228_v11  ;;  %v1060_v22 = vpack.c.bf16 %v241_v15, %v237_v14  ;;  %v236_v23 = vld [vmem:[#allocation13 + $0x2d0] sm:$0xff]  ;;  %v1420_v14 = vmov 0.0  }
  0xa3   :  { %985 = vmatprep.subr.bf16.mxu0 %v984_v32  ;;  %v255_v20 = vld [vmem:[#allocation13 + $0x368] sm:$0xff]  ;;  %v240_v24 = vld [vmem:[#allocation13 + $0x2f0] sm:$0xff]  ;;  %v1002_v25 = vpack.c.bf16 %v246_v18, %v242_v17  ;;  %v245_v26 = vld [vmem:[#allocation13 + $0x318] sm:$0xff] }
  0xa4   :  { %1047 = vmatpush1.bf16.msra.mxu1 %v1046_v49  ;;  %v249_v27 = vld [vmem:[#allocation13 + $0x338] sm:$0xff]  ;;  %v1004_v28 = vpack.c.bf16 %v255_v20, %v251_v19  ;;  %v250_v29 = vld [vmem:[#allocation13 + $0x340] sm:$0xff]  ;;  %v259_v31 = vld [vmem:[#allocation13 + $0x388] sm:$0xff]  ;;  %v1062_v33 = vpack.c.bf16 %v240_v24, %v236_v23 }
  0xa5   :  { %1049 = vmatprep.subr.bf16.mxu1 %v1048_v50  ;;  %v254_v30 = vld [vmem:[#allocation13 + $0x360] sm:$0xff]  ;;  %v263_v32 = vld [vmem:[#allocation13 + $0x3a8] sm:$0xff]  ;;  %v1064_v34 = vpack.c.bf16 %v249_v27, %v245_v26  ;;  %v244_v35 = vld [vmem:[#allocation13 + $0x310] sm:$0xff] }
  0xa6   :  { %987 = vmatpush1.bf16.msra.mxu0 %v986_v41  ;;  %v248_v36 = vld [vmem:[#allocation13 + $0x330] sm:$0xff]  ;;  %v1006_v37 = vpack.c.bf16 %v254_v30, %v250_v29  ;;  %v253_v38 = vld [vmem:[#allocation13 + $0x358] sm:$0xff]  ;;  %v1008_v40 = vpack.c.bf16 %v263_v32, %v259_v31  ;;  %v258_v41 = vld [vmem:[#allocation13 + $0x380] sm:$0xff] }
  0xa7   :  { %989 = vmatprep.subr.bf16.mxu0 %v988_v44  ;;  %v257_v39 = vld [vmem:[#allocation13 + $0x378] sm:$0xff]  ;;  %v262_v42 = vld [vmem:[#allocation13 + $0x3a0] sm:$0xff]  ;;  %v267_v43 = vld [vmem:[#allocation13 + $0x3c8] sm:$0xff]  ;;  %v1066_v45 = vpack.c.bf16 %v248_v36, %v244_v35 }
  0xa8   :  { %1051 = vmatpush1.bf16.msra.mxu1 %v1050_v61  ;;  %v271_v44 = vld [vmem:[#allocation13 + $0x3e8] sm:$0xff]  ;;  %v1068_v46 = vpack.c.bf16 %v257_v39, %v253_v38  ;;  %v252_v47 = vld [vmem:[#allocation13 + $0x350] sm:$0xff]  ;;  %v1010_v49 = vpack.c.bf16 %v262_v42, %v258_v41  ;;  %v261_v50 = vld [vmem:[#allocation13 + $0x398] sm:$0xff] }
  0xa9   :  { %1053 = vmatprep.subr.bf16.mxu1 %v1052_v62  ;;  %v256_v48 = vld [vmem:[#allocation13 + $0x370] sm:$0xff]  ;;  %v265_v51 = vld [vmem:[#allocation13 + $0x3b8] sm:$0xff]  ;;  %v1012_v52 = vpack.c.bf16 %v271_v44, %v267_v43  ;;  %v270_v54 = vld [vmem:[#allocation13 + $0x3e0] sm:$0xff] }
  0xaa   :  { %991 = vmatpush1.bf16.msra.mxu0 %v990_v53  ;;  %v266_v53 = vld [vmem:[#allocation13 + $0x3c0] sm:$0xff]  ;;  %v1070_v55 = vpack.c.bf16 %v256_v48, %v252_v47  ;;  %v260_v57 = vld [vmem:[#allocation13 + $0x390] sm:$0xff]  ;;  %v269_v60 = vld [vmem:[#allocation13 + $0x3d8] sm:$0xff] }
  0xab   :  { %993 = vmatprep.subr.bf16.mxu0 %v992_v56  ;;  %v1072_v56 = vpack.c.bf16 %v265_v51, %v261_v50  ;;  %v264_v58 = vld [vmem:[#allocation13 + $0x3b0] sm:$0xff]  ;;  %v1014_v59 = vpack.c.bf16 %v270_v54, %v266_v53  ;;  %v273_v61 = vld [vmem:[#allocation13 + $0x3f8] sm:$0xff]  ;;  %v276_v6 = vld [vmem:[%s1690_s7 + $0x8] sm:$0xff] }
  0xac   :  { %1055 = vmatpush1.bf16.msra.mxu1 %v1054_v9  ;;  %v1074_v62 = vpack.c.bf16 %v264_v58, %v260_v57  ;;  %v1076_v63 = vpack.c.bf16 %v273_v61, %v269_v60  ;;  %v268_v0 = vld [vmem:[#allocation13 + $0x3d0] sm:$0xff]  ;;  %v275_v5 = vld [vmem:[%s1690_s7] sm:$0xff]  ;;  %v521_v15 = vld [vmem:[#allocation8] sm:$0xff] }
  0xad   :  { %1057 = vmatprep.subr.bf16.mxu1 %v1056_v10  ;;  %v329_v9 = vld [vmem:[#allocation5] sm:$0xff]  ;;  %v1081_v10 = vpack.c.bf16 %v276_v6, %v275_v5  ;;  %v277_v11 = vld [vmem:[%s1690_s7 + $0x10] sm:$0xff]  ;;  %v278_v12 = vld [vmem:[%s1690_s7 + $0x18] sm:$0xff] }
  0xae   :  { %995 = vmatpush1.bf16.msra.mxu0 %v994_v1  ;;  %v272_v1 = vld [vmem:[#allocation13 + $0x3f0] sm:$0xff]  ;;  %v296_v17 = vld [vmem:[#allocation16 + $0x8] sm:$0xff]  ;;  %v279_v19 = vld [vmem:[#allocation14] sm:$0xff] }
  0xaf   :  { %997 = vmatprep.subr.bf16.mxu0 %v996_v4  ;;  %v1078_v3 = vpack.c.bf16 %v272_v1, %v268_v0  ;;  %v142_v4 = vld [vmem:[#allocation10] sm:$0xff]  ;;  %v280_v20 = vld [vmem:[#allocation14 + $0x8] sm:$0xff]  ;;  %v298_v23 = vld [vmem:[#allocation16 + $0x18] sm:$0xff]  ;;  %v314_v0 = vlaneseq }
  0xb0   :  { %1059 = vmatpush1.bf16.msra.mxu1 %v1058_v21  ;;  %v1087_v21 = vpack.c.bf16 %v280_v20, %v279_v19  ;;  %v282_v26 = vld [vmem:[#allocation14 + $0x18] sm:$0xff]  ;;  %v300_v29 = vld [vmem:[#allocation16 + $0x28] sm:$0xff]  ;;  %v283_v31 = vld [vmem:[#allocation14 + $0x20] sm:$0xff] }
  0xb1   :  { %1061 = vmatprep.subr.bf16.mxu1 %v1060_v22  ;;  %v297_v22 = vld [vmem:[#allocation16 + $0x10] sm:$0xff]  ;;  %v284_v32 = vld [vmem:[#allocation14 + $0x28] sm:$0xff]  ;;  %v302_v35 = vld [vmem:[#allocation16 + $0x38] sm:$0xff]  ;;  %v332_v1 = vshrl.u32 %v314_v0, 7 }
  0xb2   :  { %999 = vmatpush1.bf16.msra.mxu0 %v998_v13  ;;  %v1084_v13 = vpack.c.bf16 %v278_v12, %v277_v11  ;;  %v1114_v24 = vpack.c.bf16 %v298_v23, %v297_v22  ;;  %v286_v38 = vld [vmem:[#allocation14 + $0x38] sm:$0xff]  ;;  %v304_v41 = vld [vmem:[#allocation16 + $0x48] sm:$0xff]  ;;  %v287_v43 = vld [vmem:[#allocation14 + $0x40] sm:$0xff] }
  0xb3   :  { %1001 = vmatprep.subr.bf16.mxu0 %v1000_v16  ;;  %v295_v16 = vld [vmem:[#allocation16] sm:$0xff]  ;;  %v288_v44 = vld [vmem:[#allocation14 + $0x48] sm:$0xff]  ;;  %v306_v47 = vld [vmem:[#allocation16 + $0x58] sm:$0xff]  ;;  %v337_v5 = vsub.s32 1, %v332_v1  ;;  %v341_v19 = vsub.s32 2, %v332_v1 }
  0xb4   :  { %1063 = vmatpush1.bf16.msra.mxu1 %v1062_v33  ;;  %v1111_v18 = vpack.c.bf16 %v296_v17, %v295_v16  ;;  %v1093_v33 = vpack.c.bf16 %v284_v32, %v283_v31  ;;  %v290_v50 = vld [vmem:[#allocation14 + $0x58] sm:$0xff]  ;;  %v307_v51 = vld [vmem:[#allocation16 + $0x60] sm:$0xff]  ;;  %v308_v53 = vld [vmem:[#allocation16 + $0x68] sm:$0xff] }
  0xb5   :  { %1065 = vmatprep.subr.bf16.mxu1 %v1064_v34  ;;  %v301_v34 = vld [vmem:[#allocation16 + $0x30] sm:$0xff]  ;;  %v291_v54 = vld [vmem:[#allocation14 + $0x60] sm:$0xff]  ;;  %v310_v58 = vld [vmem:[#allocation16 + $0x78] sm:$0xff] }
  0xb6   :  { %1003 = vmatpush1.bf16.msra.mxu0 %v1002_v25  ;;  %v281_v25 = vld [vmem:[#allocation14 + $0x10] sm:$0xff]  ;;  %v1120_v36 = vpack.c.bf16 %v302_v35, %v301_v34  ;;  %v144_v31 = vld [vmem:[#allocation11] sm:$0xff] }
  0xb7   :  { %1005 = vmatprep.subr.bf16.mxu0 %v1004_v28  ;;  %v1090_v27 = vpack.c.bf16 %v282_v26, %v281_v25  ;;  %v299_v28 = vld [vmem:[#allocation16 + $0x20] sm:$0xff]  ;;  %v309_v57 = vld [vmem:[#allocation16 + $0x70] sm:$0xff] }
  0xb8   :  { %1067 = vmatpush1.bf16.msra.mxu1 %v1066_v45  ;;  %v1117_v30 = vpack.c.bf16 %v300_v29, %v299_v28  ;;  %v1099_v45 = vpack.c.bf16 %v288_v44, %v287_v43  ;;  %v1132_v60 = vpack.c.bf16 %v310_v58, %v309_v57  ;;  %v293_v61 = vld [vmem:[#allocation14 + $0x70] sm:$0xff]  ;;  %v315_v44 = vand.u32 127, %v314_v0  ;;  %v831_v58 = vld [vmem:[#allocation4] ss:$0 sm:$0xff] }
  0xb9   :  { %1069 = vmatprep.subr.bf16.mxu1 %v1068_v46  ;;  %v305_v46 = vld [vmem:[#allocation16 + $0x50] sm:$0xff] }
  0xba   :  { %1007 = vmatpush1.bf16.msra.mxu0 %v1006_v37  ;;  %v285_v37 = vld [vmem:[#allocation14 + $0x30] sm:$0xff]  ;;  %v1126_v48 = vpack.c.bf16 %v306_v47, %v305_v46  ;;  %vm667_vm2 = vcmp.lt.s32.totalorder %v315_v44, 4 }
  0xbb   :  { %1009 = vmatprep.subr.bf16.mxu0 %v1008_v40  ;;  %v1096_v39 = vpack.c.bf16 %v286_v38, %v285_v37  ;;  %v303_v40 = vld [vmem:[#allocation16 + $0x40] sm:$0xff] }
  0xbc   :  { %1071 = vmatpush1.bf16.msra.mxu1 %v1070_v55  ;;  %v1123_v42 = vpack.c.bf16 %v304_v41, %v303_v40  ;;  %v292_v55 = vld [vmem:[#allocation14 + $0x68] sm:$0xff] }
  0xbd   :  { %1073 = vmatprep.subr.bf16.mxu1 %v1072_v56  ;;  %v1129_v56 = vpack.c.bf16 %v308_v53, %v307_v51 }
  0xbe   :  { %1011 = vmatpush1.bf16.msra.mxu0 %v1010_v49  ;;  %v289_v49 = vld [vmem:[#allocation14 + $0x50] sm:$0xff] }
  0xbf   :  { %1013 = vmatprep.subr.bf16.mxu0 %v1012_v52  ;;  %v1102_v52 = vpack.c.bf16 %v290_v50, %v289_v49  ;;  %v830_v49 = vld [vmem:[%s1694_s11] ss:$0 sm:$0xff] }
  0xc0   :  { %1075 = vmatpush1.bf16.msra.mxu1 %v1074_v62  ;;  %v294_v62 = vld [vmem:[#allocation14 + $0x78] sm:$0xff] }
  0xc1   :  { %1077 = vmatprep.subr.bf16.mxu1 %v1076_v63  ;;  %v1108_v63 = vpack.c.bf16 %v294_v62, %v293_v61 }
  0xc2   :  { %1015 = vmatpush1.bf16.msra.mxu0 %v1014_v59  ;;  %v1105_v59 = vpack.c.bf16 %v292_v55, %v291_v54 }
  0xc3   :  { %1080 = vmatprep.subr.bf16.mxu0 %v1418_v2 }
  0xc4   :  { %1079 = vmatpush1.bf16.msra.mxu1 %v1078_v3  ;;  %v333_v3 = vsub.s32 0, %v332_v1 }
  0xc5   :  { %1086 = vmatprep.subr.bf16.mxu1 %v1418_v2 }
 0x102   :  { %v1608_v7 = vpop.permute.xlu0 %323 }
 0x103   :  { %v326_v8 = vmul.f32 %v1608_v7, %v142_v4  ;;  %v274_v4 = vld [vmem:[%s1689_s6] sm:$0xf]  ;;  %v328_v34 = vmul.f32 %v1608_v7, %v144_v31 }
 0x104   :  { %v334_v6 = vrot.slane %v274_v4, %v333_v3  ;;  %v829_v7 = vld [vmem:[%s1693_s10] ss:$0 sm:$0xff]  ;;  %s1421_s10 = smov [#allocation18]  }
 0x105   :  { %415 = vmatprep.mubr.f32.mxu0 %v326_v8  ;;  %486 = vmatprep.mubr.f32.mxu1 %v326_v8  ;;  %v338_v8 = vrot.slane %v274_v4, %v337_v5  ;;  %s795_s30 = sshll.u32 %s1421_s10, 4  ;;  %s796_s30 = int_to_ptr.vmem [resolvable:$true] %s795_s30 }
 0x106   :  { %416 = vmatmul.mubr.f32.vlgmr.msra.gmra.mrb[0].mxu0 %v329_v9  ;;  %487 = vmatmul.mubr.f32.vlgmr.msra.gmra.mrb[0].mxu1 %v329_v9  ;;  %v345_v9 = vsub.s32 3, %v332_v1  ;;  %s1328_s11 = scalar_lea.vmem %s796_s30, 128  ;;  %p1333_p1 = scmp.lt.s32.totalorder %s796_s30, %s796_s30 }
 0x107   :  { %1082 = vmatpush3.bf16.msra.mxu0 %v1081_v10  ;;  %879 = vmatprep.mubr.msk.f32.mxu0 %vm1419_vm0, %v1420_v14  ;;  %p1329_p0 = scmp.ne.s32.totalorder %s796_s30, %s1328_s11  ;;  %p1334_p2 = scmp.lt.s32.totalorder %s1328_s11, %s1328_s11 }
 0x108   :  { %1083 = vmatprep.subr.bf16.mxu0 %v1418_v2  ;;  %914 = vmatprep.mubr.msk.f32.mxu1 %vm1419_vm0, %v1420_v14  ;;  %v346_v17 = vrot.slane %v274_v4, %v345_v9 }
 0x109   :  { %1088 = vmatpush3.bf16.msra.mxu1 %v1087_v21  ;;  %v342_v21 = vrot.slane %v274_v4, %v341_v19  ;;  %p1335_p3 = por %p1334_p2, %p1333_p1 }
 0x10a   :  { %1089 = vmatprep.subr.bf16.mxu1 %v1418_v2 }
 0x10b   :  { %1085 = vmatpush3.bf16.msra.mxu0 %v1084_v13  ;;  %p1336_p4 = pnand %p1335_p3, %p1329_p0 }
 0x10c   :  { %1110 = vmatprep.subr.bf16.mxu0 %v1418_v2 }
 0x10d   :  { %1091 = vmatpush3.bf16.msra.mxu1 %v1090_v27 }
 0x10e   :  { %880 = vmatmul.mubr.msk.f32.vlgmr.msra.gmra.mrb[2].mxu0 %vm522_vm1, %v521_v15  ;;  %1092 = vmatprep.subr.bf16.mxu1 %v1418_v2 }
 0x10f   :  { %949 = vmatprep.mubr.msk.f32.mxu0 %vm1419_vm0, %v1420_v14  ;;  %1112 = vmatpush3.bf16.msra.mxu0 %v1111_v18 }
 0x110   :  { %1113 = vmatprep.subr.bf16.mxu0 %v1418_v2 }
 0x111   :  { %1094 = vmatpush3.bf16.msra.mxu1 %v1093_v33 }
 0x112   :  { %1095 = vmatprep.subr.bf16.mxu1 %v1418_v2 }
 0x113   :  { %1115 = vmatpush3.bf16.msra.mxu0 %v1114_v24 }
 0x114   :  { %1116 = vmatprep.subr.bf16.mxu0 %v1418_v2 }
 0x115   :  { %1097 = vmatpush3.bf16.msra.mxu1 %v1096_v39 }
 0x116   :  { %1098 = vmatprep.subr.bf16.mxu1 %v1418_v2 }
 0x117   :  { %1118 = vmatpush3.bf16.msra.mxu0 %v1117_v30 }
 0x118   :  { %1119 = vmatprep.subr.bf16.mxu0 %v1418_v2 }
 0x119   :  { %1100 = vmatpush3.bf16.msra.mxu1 %v1099_v45 }
 0x11a   :  { %1101 = vmatprep.subr.bf16.mxu1 %v1418_v2 }
 0x11b   :  { %1121 = vmatpush3.bf16.msra.mxu0 %v1120_v36 }
 0x11c   :  { %1122 = vmatprep.subr.bf16.mxu0 %v1418_v2 }
 0x11d   :  { %1103 = vmatpush3.bf16.msra.mxu1 %v1102_v52 }
 0x11e   :  { %1104 = vmatprep.subr.bf16.mxu1 %v1418_v2 }
 0x11f   :  { %1124 = vmatpush3.bf16.msra.mxu0 %v1123_v42 }
 0x120   :  { %1125 = vmatprep.subr.bf16.mxu0 %v1418_v2 }
 0x121   :  { %1106 = vmatpush3.bf16.msra.mxu1 %v1105_v59 }
 0x122   :  { %1107 = vmatprep.subr.bf16.mxu1 %v1418_v2 }
 0x123   :  { %1127 = vmatpush3.bf16.msra.mxu0 %v1126_v48 }
 0x124   :  { %1128 = vmatprep.subr.bf16.mxu0 %v1418_v2 }
 0x125   :  { %1109 = vmatpush3.bf16.msra.mxu1 %v1108_v63 }
 0x127   :  { %1130 = vmatpush3.bf16.msra.mxu0 %v1129_v56 }
 0x128   :  { %1131 = vmatprep.subr.bf16.mxu0 %v1418_v2 }
 0x12b   :  { %1133 = vmatpush3.bf16.msra.mxu0 %v1132_v60 }
 0x1d9   :  { %v417_v10 = vpop.f32.mrb[0].mxu0  ;;  %v488_v11 = vpop.f32.mrb[0].mxu1 }
 0x1da   :  { %v418_v12 = vadd.f32 %v417_v10, %v334_v6  ;;  %v419_v2 = vpop.f32.mrb[1].mxu0  ;;  %v490_v13 = vpop.f32.mrb[1].mxu1  ;;  %v489_v25 = vadd.f32 %v488_v11, %v342_v21 }
 0x1db   :  { %v420_v15 = vadd.f32 %v419_v2, %v338_v8  ;;  %v491_v20 = vadd.f32 %v490_v13, %v346_v17 }
 0x1dc   :  { %v825_v16 = vmul.f32 -1.442695, %v418_v12 }
 0x1dd   :  { %v826_v18 = vmul.f32 -1.442695, %v420_v15  ;;  %v827_v24 = vmul.f32 -1.442695, %v491_v20 }
 0x1de   :  { %1154 = vpow2.f32 %v825_v16 }
 0x1df   :  { %1156 = vpow2.f32 %v826_v18 }
 0x1e0   :  { %1158 = vpow2.f32 %v827_v24 }
 0x1e1   :  { %v592_v22 = vpop.f32.mrb[2].mxu0  ;;  %1160 = vtanh.f32 %v489_v25 }
 0x1e2   :  { %v881_v23 = vpop.f32.mrb[3].mxu0 }
 0x1e8   :  { %v1155_v26 = vpop.eup %1154 }
 0x1e9   :  { %v1157_v27 = vpop.eup %1156  ;;  %v499_v28 = vadd.f32 1.0, %v1155_v26 }
 0x1ea   :  { %v500_v29 = vadd.f32 1.0, %v1157_v27  ;;  %v1159_v30 = vpop.eup %1158 }
 0x1eb   :  { %1162 = vrcp.f32 %v499_v28  ;;  %v1161_v32 = vpop.eup %1160  ;;  %v509_v35 = vadd.f32 1.0, %v1159_v30 }
 0x1ec   :  { %1164 = vrcp.f32 %v500_v29 }
 0x1ed   :  { %1166 = vrcp.f32 %v509_v35 }
 0x1f5   :  { %v1163_v33 = vpop.eup %1162 }
 0x1f6   :  { %v1165_v36 = vpop.eup %1164  ;;  %v513_v37 = vmul.f32 %v1163_v33, %v1161_v32 }
 0x1f7   :  { %v512_v38 = vmul.f32 %v1165_v36, %v328_v34  ;;  %v1167_v40 = vpop.eup %1166 }
 0x1f9   :  { %v514_v39 = vadd.f32 %v513_v37, %v512_v38 }
 0x1fb   :  { %520 = vst [vmem:[#allocation20] sm:$0xff] %v514_v39  ;;  %1168 = vtanh.f32 %v514_v39 }
 0x205   :  { %v1169_v41 = vpop.eup %1168 }
 0x206   :  { %v516_v42 = vmul.f32 %v1169_v41, %v1167_v40 }
 0x208   :  { %v596_v43 = vmul.f32 %v592_v22, %v516_v42  ;;  %519 = vst [vmem:[#allocation18] sm:$0xff] %v516_v42  ;;  %950 = vmatmul.mubr.f32.vlgmr.msra.gmra.mrb[4].mxu0 %v516_v42 }
 0x20a   :  { %915 = vmatmul.mubr.f32.vlgmr.msra.gmra.mrb[2].mxu1 %v596_v43 }
 0x2db   :  { %v750_v45 = vpop.f32.mrb[4].mxu0 }
 0x2dc   :  { %v751_v46 = vadd.f32 %v829_v7, %v750_v45  ;;  %v951_v47 = vpop.f32.mrb[5].mxu0 }
 0x2dd   :  { %v663_v48 = vpop.f32.mrb[2].mxu1 }
 0x2de   :  { %v754_v50 = vmax.f32 %v751_v46, 0.0  ;;  %v916_v51 = vpop.f32.mrb[3].mxu1  ;;  %v668_v52 = vsel %vm667_vm2, %v663_v48, -1e+30 }
 0x2df   :  { %669 = vmax.xlane.f32.xlu0 %v668_v52 }
 0x2e0   :  { %v761_v53 = vmul.f32 %v830_v49, %v754_v50 }
 0x2e2   :  { %762 = vadd.xlane.f32.xlu1 %v761_v53 }
 0x36c   :  { %v670_v54 = vpop.xlane.xlu0 %669 }
 0x36d   :  { %v671_v55 = vsub.f32 %v668_v52, %v670_v54 }
 0x36f   :  { %v672_v56 = vmul.f32 1.442695, %v671_v55  ;;  %v763_v59 = vpop.xlane.xlu1 %762 }
 0x370   :  { %v770_v60 = vadd.f32 %v831_v58, %v763_v59 }
 0x371   :  { %1170 = vpow2.f32 %v672_v56 }
 0x37b   :  { %v1171_v57 = vpop.eup %1170 }
 0x37c   :  { %674 = vadd.xlane.f32.xlu1 %v1171_v57 }
 0x38d   :  { %773 = vperm.xlu1 %1153, %v770_v60  }
 0x38e   :  { %1339 = shalt.err (!%p1336_p4)
}
 0x38f   :  { %s1340_s16 = scalar_lea.hbm %s1697_s14, 128 }
 0x390   :  { %p1341_p5 = scmp.ne.s32.totalorder %s1697_s14, %s1340_s16  ;;  %p1344_p6 = scmp.lt.u32.totalorder %s1340_s16, %s1697_s14 }
 0x392   :  { %p1346_p7 = pnand %p1344_p6, %p1341_p5 }
 0x394   :  { %1349 = shalt.err (!%p1346_p7)
}
 0x395   :  { %798 = dma.vmem_to_hbm [thread:$0]  %s796_s30, 128, %s1697_s14, [#allocation19]  }
 0x396   :  { %s1422_s20 = smov [#allocation20]  }
 0x397   :  { %s805_s22 = sshll.u32 %s1422_s20, 4  ;;  %s806_s22 = int_to_ptr.vmem [resolvable:$true] %s805_s22 }
 0x398   :  { %s1350_s2 = scalar_lea.vmem %s806_s22, 128  ;;  %p1355_p9 = scmp.lt.s32.totalorder %s806_s22, %s806_s22 }
 0x399   :  { %p1351_p8 = scmp.ne.s32.totalorder %s806_s22, %s1350_s2  ;;  %p1356_p10 = scmp.lt.s32.totalorder %s1350_s2, %s1350_s2 }
 0x39b   :  { %p1357_p11 = por %p1356_p10, %p1355_p9 }
 0x39d   :  { %p1358_p12 = pnand %p1357_p11, %p1351_p8 }
 0x39f   :  { %1361 = shalt.err (!%p1358_p12)
}
 0x3a0   :  { %s1362_s23 = scalar_lea.hbm %s1698_s15, 128 }
 0x3a1   :  { %p1363_p13 = scmp.ne.s32.totalorder %s1698_s15, %s1362_s23  ;;  %p1366_p0 = scmp.lt.u32.totalorder %s1362_s23, %s1698_s15 }
 0x3a3   :  { %p1368_p1 = pnand %p1366_p0, %p1363_p13 }
 0x3a5   :  { %1371 = shalt.err (!%p1368_p1)
}
 0x3a6   :  { %808 = dma.vmem_to_hbm [thread:$0]  %s806_s22, 128, %s1698_s15, [#allocation19]   ;;  %vm316_vm3 = vcmp.eq.s32.totalorder %v315_v44, 4 }
 0x3a7   :  { %v824_v62 = vsel %vm316_vm3, 1.0, %v1420_v14  ;;  %s1423_s26 = smov [#allocation17]  }
 0x3a8   :  { %s785_s6 = sshll.u32 %s1423_s26, 4  ;;  %s786_s6 = int_to_ptr.vmem [resolvable:$true] %s785_s6 }
 0x3a9   :  { %s1372_s1 = scalar_lea.vmem %s786_s6, 128  ;;  %p1377_p3 = scmp.lt.s32.totalorder %s786_s6, %s786_s6 }
 0x3aa   :  { %p1373_p2 = scmp.ne.s32.totalorder %s786_s6, %s1372_s1  ;;  %p1378_p4 = scmp.lt.s32.totalorder %s1372_s1, %s1372_s1 }
 0x3ac   :  { %p1379_p5 = por %p1378_p4, %p1377_p3 }
 0x3ae   :  { %p1380_p6 = pnand %p1379_p5, %p1373_p2 }
 0x409   :  { %v675_v61 = vpop.xlane.xlu1 %674 }
 0x40a   :  { %1172 = vrcp.f32 %v675_v61 }
 0x40d   :  { %v774_v63 = vpop.permute.xlu1 %773 }
 0x40e   :  { %v776_v3 = vmul.f32 %v824_v62, %v774_v63 }
 0x414   :  { %v1173_v0 = vpop.eup %1172 }
 0x415   :  { %v677_v1 = vmul.f32 %v1173_v0, %v1171_v57 }
 0x417   :  { %v777_v4 = vadd.f32 %v776_v3, %v677_v1 }
 0x419   :  { %778 = vst [vmem:[#allocation17] sm:$0xff] %v777_v4 }
 0x41a   :  { %1383 = shalt.err (!%p1380_p6)
}
 0x41b   :  { %s1384_s29 = scalar_lea.hbm %s1696_s13, 128 }
 0x41c   :  { %p1385_p7 = scmp.ne.s32.totalorder %s1696_s13, %s1384_s29  ;;  %p1388_p8 = scmp.lt.u32.totalorder %s1384_s29, %s1696_s13 }
 0x41e   :  { %p1390_p9 = pnand %p1388_p8, %p1385_p7 }
 0x420   :  { %1393 = shalt.err (!%p1390_p9)
}
 0x421   :  { %788 = dma.vmem_to_hbm [thread:$0]  %s786_s6, 128, %s1696_s13, [#allocation7]  }
 0x422   :  { %1402 = dma.done.wait [#allocation7], 128  }
 0x423   :  { %1403 = vsyncadd [#allocation7], 4294967168 }
 0x424   :  { %1404 = dma.done.wait [#allocation19], 256  }
 0x425   :  { %1405 = vsyncadd [#allocation19], 4294967040 }
 0x426   :  { %818 = vsyncpa [#allocation6], 1 }
 0x427   :  { %819 = vsyncpa [#allocation9], 1 }
 0x428   :  { %820 = vsyncpa [#allocation12], 1 }
 0x429   :  { %821 = vsyncpa [#allocation15], 1 }
 0x42a   :  { %822 = vsyncpa [#allocation7], 1 }
 0x42b   :  { %823 = vsyncpa [#allocation19], 1 }

</bundles_post_ra>
